<compile_context>
chip_gen: v6e
topology: v6e:2x2x1
jax: 0.10.0
libtpu: 0.0.40
codegen_flags: <defaults>
</compile_context>

<pallas_src>
import math

import jax
import jax.numpy as jnp
import numpy as np
from jax.experimental import pallas as pl
from jax.experimental.pallas import tpu as pltpu  # noqa: F401  (TPU backend registration)

# ----------------------- model hyper-parameters (small) -----------------------
NUM_LAYERS = 2   # number of EncoderBlocks in the TransformerEncoder
B = 2            # batch
S = 8            # sequence length
D = 32           # input_dim == embed_dim
H = 4            # num_heads
HD = D // H      # head_dim
F = 64           # dim_feedforward
EPS = 1e-5       # LayerNorm eps (PyTorch default)
ATTN_SCALE = 1.0 / math.sqrt(HD)


def _layernorm(x, gamma, beta):
    # PyTorch LayerNorm: biased variance over the last dim.
    mean = jnp.mean(x, axis=-1, keepdims=True)
    var = jnp.mean(jnp.square(x - mean), axis=-1, keepdims=True)
    return (x - mean) * jax.lax.rsqrt(var + EPS) * gamma + beta


# ----------------------------------------------------------------------------
# Kernel: the entire TransformerEncoder forward (all layers, whole batch).
# ----------------------------------------------------------------------------
def transformer_encoder_kernel(
    x_ref,                 # (B*S, D)
    wqkv_ref, bqkv_ref,    # (L, D, 3D), (L, 1, 3D)  cols = [Q_h0..h3 | K_h0..h3 | V_h0..h3]
    wo_ref, bo_ref,        # (L, D, D),  (L, 1, D)
    w1_ref, b1_ref,        # (L, D, F),  (L, 1, F)
    w2_ref, b2_ref,        # (L, F, D),  (L, 1, D)
    g1_ref, be1_ref,       # (L, 1, D),  (L, 1, D)
    g2_ref, be2_ref,       # (L, 1, D),  (L, 1, D)
    o_ref,                 # (B*S, D)
):
    x = x_ref[...]                                                     # (B*S, D)

    for l in range(NUM_LAYERS):
        # ---------------- fused QKV projection: ONE (16,32)@(32,96) matmul ----------------
        qkv = jnp.dot(x, wqkv_ref[l], preferred_element_type=jnp.float32) + bqkv_ref[l]

        # ---------------- attention: one independent chain per head (unrolled) ------------
        head_vals = []
        for h in range(H):
            # Static 8-lane slices of the fused QKV output (cheap select/shift ops).
            q = qkv[:, h * HD:(h + 1) * HD].reshape(B, S, HD)
            k = qkv[:, D + h * HD:D + (h + 1) * HD].reshape(B, S, HD)
            v = qkv[:, 2 * D + h * HD:2 * D + (h + 1) * HD].reshape(B, S, HD)

            # Scaled dot-product attention, batched over B (scale applied to logits,
            # matching the reference rounding order).
            logits = jnp.einsum("bqd,bkd->bqk", q, k,
                                preferred_element_type=jnp.float32) * ATTN_SCALE
            m = jnp.max(logits, axis=-1, keepdims=True)
            e = jnp.exp(logits - m)
            p = e / jnp.sum(e, axis=-1, keepdims=True)                  # exact softmax
            vals = jnp.einsum("bqk,bkd->bqd", p, v,
                              preferred_element_type=jnp.float32)       # (B, S, HD)
            head_vals.append(vals.reshape(B * S, HD))

        # ---------------- fused output projection: lane concat + ONE (32,32) matmul -------
        attn_in = jnp.concatenate(head_vals, axis=-1)                   # (B*S, D)
        attn_out = jnp.dot(attn_in, wo_ref[l],
                           preferred_element_type=jnp.float32) + bo_ref[l]

        # ---------------- residual + LayerNorm 1 ----------------
        x = _layernorm(x + attn_out, g1_ref[l], be1_ref[l])

        # ---------------- feed-forward network ----------------
        h1 = jnp.dot(x, w1_ref[l], preferred_element_type=jnp.float32) + b1_ref[l]
        h1 = jnp.maximum(h1, 0.0)                                       # ReLU
        ff = jnp.dot(h1, w2_ref[l], preferred_element_type=jnp.float32) + b2_ref[l]

        # ---------------- residual + LayerNorm 2 ----------------
        x = _layernorm(x + ff, g2_ref[l], be2_ref[l])

    o_ref[...] = x


# ----------------------------------------------------------------------------
# Wrapper-side, one-time parameter preparation (lane-dense fused layouts).
# ----------------------------------------------------------------------------
def _prepare_layer(p):
    """Reorder fused QKV columns from per-head [Q_h|K_h|V_h] groups to [Q_all|K_all|V_all]."""
    wqkv, bqkv, wo, bo, w1, b1, w2, b2, g1, be1, g2, be2 = p
    w = jnp.transpose(wqkv.reshape(D, H, 3, HD), (0, 2, 1, 3)).reshape(D, 3 * D)
    b = jnp.transpose(bqkv.reshape(H, 3, HD), (1, 0, 2)).reshape(1, 3 * D)
    return (w, b, wo, bo, w1, b1, w2, b2, g1, be1, g2, be2)


def prepare_kernel_params(layer_params):
    per_layer = [_prepare_layer(p) for p in layer_params]
    n = len(per_layer[0])
    return tuple(jnp.stack([layer[i] for layer in per_layer], axis=0) for i in range(n))


def transformer_encoder(x, layer_params):
    kparams = prepare_kernel_params(layer_params)      # one-time weight transform
    x2 = x.reshape(B * S, D)                            # free reshape at XLA level

    out2 = pl.pallas_call(
        transformer_encoder_kernel,
        out_shape=jax.ShapeDtypeStruct((B * S, D), jnp.float32),
        # No grid / no BlockSpecs: single kernel step, every operand resident in VMEM.
    )(x2, *kparams)

    return out2.reshape(B, S, D)


# ----------------------------------------------------------------------------
# Pure-JAX reference (mirrors the PyTorch module) for verification.
# ----------------------------------------------------------------------------
def encoder_block_ref(x, p):
    wqkv, bqkv, wo, bo, w1, b1, w2, b2, g1, be1, g2, be2 = p
    bsz, seq, _ = x.shape
    qkv = x @ wqkv + bqkv                                            # (B, S, 3D)
    qkv = qkv.reshape(bsz, seq, H, 3 * HD).transpose(0, 2, 1, 3)     # (B, H, S, 3HD)
    q, k, v = qkv[..., :HD], qkv[..., HD:2 * HD], qkv[..., 2 * HD:]
    logits = jnp.einsum("bhqd,bhkd->bhqk", q, k) / math.sqrt(HD)
    attn = jax.nn.softmax(logits, axis=-1)
    vals = jnp.einsum("bhqk,bhkd->bhqd", attn, v)                    # (B, H, S, HD)
    vals = vals.transpose(0, 2, 1, 3).reshape(bsz, seq, D)
    attn_out = vals @ wo + bo
    x = _layernorm(x + attn_out, g1, be1)
    ff = jnp.maximum(x @ w1 + b1, 0.0) @ w2 + b2
    return _layernorm(x + ff, g2, be2)


def transformer_encoder_ref(x, layer_params):
    for p in layer_params:
        x = encoder_block_ref(x, p)
    return x


# ----------------------------------------------------------------------------
# Parameter init (weights pre-transposed: y = x @ W + b). Random biases are used
# (instead of the module's zero-init for qkv/o) purely to strengthen the test.
# ----------------------------------------------------------------------------
def init_layer_params(key):
    kqkv, ko, k1, kb1, k2, kb2, kbq, kbo = jax.random.split(key, 8)

    def xavier(k, fan_in, fan_out, shape):
        bound = math.sqrt(6.0 / (fan_in + fan_out))
        return jax.random.uniform(k, shape, jnp.float32, -bound, bound)

    def uniform_pm(k, bound, shape):
        return jax.random.uniform(k, shape, jnp.float32, -bound, bound)

    wqkv = xavier(kqkv, D, 3 * D, (D, 3 * D))
    bqkv = uniform_pm(kbq, 0.5, (1, 3 * D))
    wo = xavier(ko, D, D, (D, D))
    bo = uniform_pm(kbo, 0.5, (1, D))
    w1 = uniform_pm(k1, 1.0 / math.sqrt(D), (D, F))
    b1 = uniform_pm(kb1, 1.0 / math.sqrt(D), (1, F))
    w2 = uniform_pm(k2, 1.0 / math.sqrt(F), (F, D))
    b2 = uniform_pm(kb2, 1.0 / math.sqrt(F), (1, D))
    g1 = jnp.ones((1, D), jnp.float32)
    be1 = jnp.zeros((1, D), jnp.float32)
    g2 = jnp.ones((1, D), jnp.float32)
    be2 = jnp.zeros((1, D), jnp.float32)
    return (wqkv, bqkv, wo, bo, w1, b1, w2, b2, g1, be1, g2, be2)


if __name__ == "__main__":
    key = jax.random.PRNGKey(0)
    kx, kp = jax.random.split(key)
    x = jax.random.normal(kx, (B, S, D), jnp.float32)
    layer_keys = jax.random.split(kp, NUM_LAYERS)
    layer_params = [init_layer_params(k) for k in layer_keys]

    out = transformer_encoder(x, layer_params)
    out = jax.block_until_ready(out)

    ref = transformer_encoder_ref(x, layer_params)
    # Tolerance absorbs possible Mosaic-vs-XLA f32 MXU precision differences (the kernel
    # itself uses exact softmax and the reference rounding order for the attention scale);
    # genuine layout/math bugs would produce O(0.1-1) errors.
    np.testing.assert_allclose(np.asarray(out), np.asarray(ref), atol=1e-2, rtol=1e-2)

    print("KERNEL_OK")
</pallas_src>

<mosaic_0001>
module attributes {stable_mosaic.version = 11 : i64} {
  func.func @transformer_encoder_kernel(%arg0: memref<16x32xf32, #tpu.memory_space<vmem>>, %arg1: memref<2x32x96xf32, #tpu.memory_space<vmem>>, %arg2: memref<2x1x96xf32, #tpu.memory_space<vmem>>, %arg3: memref<2x32x32xf32, #tpu.memory_space<vmem>>, %arg4: memref<2x1x32xf32, #tpu.memory_space<vmem>>, %arg5: memref<2x32x64xf32, #tpu.memory_space<vmem>>, %arg6: memref<2x1x64xf32, #tpu.memory_space<vmem>>, %arg7: memref<2x64x32xf32, #tpu.memory_space<vmem>>, %arg8: memref<2x1x32xf32, #tpu.memory_space<vmem>>, %arg9: memref<2x1x32xf32, #tpu.memory_space<vmem>>, %arg10: memref<2x1x32xf32, #tpu.memory_space<vmem>>, %arg11: memref<2x1x32xf32, #tpu.memory_space<vmem>>, %arg12: memref<2x1x32xf32, #tpu.memory_space<vmem>>, %arg13: memref<16x32xf32, #tpu.memory_space<vmem>>) attributes {dimension_semantics = [], scalar_prefetch = 0 : i64, scratch_operands = 0 : i64, tpu.core_type = #tpu.core_type<tc>} {
    %c0 = arith.constant 0 : index
    %c0_0 = arith.constant 0 : index
    %0 = vector.load %arg0[%c0, %c0_0] : memref<16x32xf32, #tpu.memory_space<vmem>>, vector<16x32xf32>
    %c0_1 = arith.constant 0 : index
    %c0_2 = arith.constant 0 : index
    %c0_3 = arith.constant 0 : index
    %1 = vector.load %arg1[%c0_1, %c0_2, %c0_3] : memref<2x32x96xf32, #tpu.memory_space<vmem>>, vector<1x32x96xf32>
    %2 = vector.shape_cast %1 : vector<1x32x96xf32> to vector<32x96xf32>
    %cst = arith.constant dense<0.000000e+00> : vector<16x96xf32>
    %3 = tpu.matmul %0, %2, %cst {dimension_numbers = #tpu.dot_dimension_numbers<[1], [0], [0], [1], [0, 0, 1, 1], [], []>} : vector<16x32xf32>, vector<32x96xf32>, vector<16x96xf32> -> vector<16x96xf32>
    %c0_4 = arith.constant 0 : index
    %c0_5 = arith.constant 0 : index
    %c0_6 = arith.constant 0 : index
    %4 = vector.load %arg2[%c0_4, %c0_5, %c0_6] : memref<2x1x96xf32, #tpu.memory_space<vmem>>, vector<1x1x96xf32>
    %5 = vector.shape_cast %4 : vector<1x1x96xf32> to vector<1x96xf32>
    %6 = vector.broadcast %5 : vector<1x96xf32> to vector<16x96xf32>
    %7 = arith.addf %3, %6 : vector<16x96xf32>
    %8 = vector.extract_strided_slice %7 {offsets = [0, 0], sizes = [16, 8], strides = [1, 1]} : vector<16x96xf32> to vector<16x8xf32>
    %9 = vector.shape_cast %8 : vector<16x8xf32> to vector<2x8x8xf32>
    %10 = vector.extract_strided_slice %7 {offsets = [0, 32], sizes = [16, 8], strides = [1, 1]} : vector<16x96xf32> to vector<16x8xf32>
    %11 = vector.shape_cast %10 : vector<16x8xf32> to vector<2x8x8xf32>
    %12 = vector.extract_strided_slice %7 {offsets = [0, 64], sizes = [16, 8], strides = [1, 1]} : vector<16x96xf32> to vector<16x8xf32>
    %13 = vector.shape_cast %12 : vector<16x8xf32> to vector<2x8x8xf32>
    "tpu.trace_start"() <{level = 10 : i32, message = "bqd,bkd->bqk"}> : () -> ()
    %cst_7 = arith.constant dense<0.000000e+00> : vector<2x8x8xf32>
    %14 = tpu.matmul %9, %11, %cst_7 {dimension_numbers = #tpu.dot_dimension_numbers<[2], [2], [1], [1], [0, 0, 0, 1, 1, 1], [0], [0]>} : vector<2x8x8xf32>, vector<2x8x8xf32>, vector<2x8x8xf32> -> vector<2x8x8xf32>
    "tpu.trace_stop"() : () -> ()
    %cst_8 = arith.constant 0.353553385 : f32
    %15 = vector.broadcast %cst_8 : f32 to vector<2x8x8xf32>
    %16 = arith.mulf %14, %15 : vector<2x8x8xf32>
    %cst_9 = arith.constant dense<0xFF800000> : vector<2x8xf32>
    %17 = vector.multi_reduction <maximumf>, %16, %cst_9 [2] : vector<2x8x8xf32> to vector<2x8xf32>
    %18 = vector.shape_cast %17 : vector<2x8xf32> to vector<2x8x1xf32>
    %19 = vector.broadcast %18 : vector<2x8x1xf32> to vector<2x8x8xf32>
    %20 = arith.subf %16, %19 : vector<2x8x8xf32>
    %21 = math.exp %20 : vector<2x8x8xf32>
    %cst_10 = arith.constant dense<0.000000e+00> : vector<2x8xf32>
    %22 = vector.multi_reduction <add>, %21, %cst_10 [2] : vector<2x8x8xf32> to vector<2x8xf32>
    %23 = vector.shape_cast %22 : vector<2x8xf32> to vector<2x8x1xf32>
    %24 = vector.broadcast %23 : vector<2x8x1xf32> to vector<2x8x8xf32>
    %25 = arith.divf %21, %24 : vector<2x8x8xf32>
    "tpu.trace_start"() <{level = 10 : i32, message = "bqk,bkd->bqd"}> : () -> ()
    %cst_11 = arith.constant dense<0.000000e+00> : vector<2x8x8xf32>
    %26 = tpu.matmul %25, %13, %cst_11 {dimension_numbers = #tpu.dot_dimension_numbers<[2], [1], [1], [2], [0, 0, 0, 1, 1, 2], [0], [0]>} : vector<2x8x8xf32>, vector<2x8x8xf32>, vector<2x8x8xf32> -> vector<2x8x8xf32>
    "tpu.trace_stop"() : () -> ()
    %27 = vector.shape_cast %26 : vector<2x8x8xf32> to vector<16x8xf32>
    %28 = vector.extract_strided_slice %7 {offsets = [0, 8], sizes = [16, 8], strides = [1, 1]} : vector<16x96xf32> to vector<16x8xf32>
    %29 = vector.shape_cast %28 : vector<16x8xf32> to vector<2x8x8xf32>
    %30 = vector.extract_strided_slice %7 {offsets = [0, 40], sizes = [16, 8], strides = [1, 1]} : vector<16x96xf32> to vector<16x8xf32>
    %31 = vector.shape_cast %30 : vector<16x8xf32> to vector<2x8x8xf32>
    %32 = vector.extract_strided_slice %7 {offsets = [0, 72], sizes = [16, 8], strides = [1, 1]} : vector<16x96xf32> to vector<16x8xf32>
    %33 = vector.shape_cast %32 : vector<16x8xf32> to vector<2x8x8xf32>
    "tpu.trace_start"() <{level = 10 : i32, message = "bqd,bkd->bqk"}> : () -> ()
    %cst_12 = arith.constant dense<0.000000e+00> : vector<2x8x8xf32>
    %34 = tpu.matmul %29, %31, %cst_12 {dimension_numbers = #tpu.dot_dimension_numbers<[2], [2], [1], [1], [0, 0, 0, 1, 1, 1], [0], [0]>} : vector<2x8x8xf32>, vector<2x8x8xf32>, vector<2x8x8xf32> -> vector<2x8x8xf32>
    "tpu.trace_stop"() : () -> ()
    %cst_13 = arith.constant 0.353553385 : f32
    %35 = vector.broadcast %cst_13 : f32 to vector<2x8x8xf32>
    %36 = arith.mulf %34, %35 : vector<2x8x8xf32>
    %cst_14 = arith.constant dense<0xFF800000> : vector<2x8xf32>
    %37 = vector.multi_reduction <maximumf>, %36, %cst_14 [2] : vector<2x8x8xf32> to vector<2x8xf32>
    %38 = vector.shape_cast %37 : vector<2x8xf32> to vector<2x8x1xf32>
    %39 = vector.broadcast %38 : vector<2x8x1xf32> to vector<2x8x8xf32>
    %40 = arith.subf %36, %39 : vector<2x8x8xf32>
    %41 = math.exp %40 : vector<2x8x8xf32>
    %cst_15 = arith.constant dense<0.000000e+00> : vector<2x8xf32>
    %42 = vector.multi_reduction <add>, %41, %cst_15 [2] : vector<2x8x8xf32> to vector<2x8xf32>
    %43 = vector.shape_cast %42 : vector<2x8xf32> to vector<2x8x1xf32>
    %44 = vector.broadcast %43 : vector<2x8x1xf32> to vector<2x8x8xf32>
    %45 = arith.divf %41, %44 : vector<2x8x8xf32>
    "tpu.trace_start"() <{level = 10 : i32, message = "bqk,bkd->bqd"}> : () -> ()
    %cst_16 = arith.constant dense<0.000000e+00> : vector<2x8x8xf32>
    %46 = tpu.matmul %45, %33, %cst_16 {dimension_numbers = #tpu.dot_dimension_numbers<[2], [1], [1], [2], [0, 0, 0, 1, 1, 2], [0], [0]>} : vector<2x8x8xf32>, vector<2x8x8xf32>, vector<2x8x8xf32> -> vector<2x8x8xf32>
    "tpu.trace_stop"() : () -> ()
    %47 = vector.shape_cast %46 : vector<2x8x8xf32> to vector<16x8xf32>
    %48 = vector.extract_strided_slice %7 {offsets = [0, 16], sizes = [16, 8], strides = [1, 1]} : vector<16x96xf32> to vector<16x8xf32>
    %49 = vector.shape_cast %48 : vector<16x8xf32> to vector<2x8x8xf32>
    %50 = vector.extract_strided_slice %7 {offsets = [0, 48], sizes = [16, 8], strides = [1, 1]} : vector<16x96xf32> to vector<16x8xf32>
    %51 = vector.shape_cast %50 : vector<16x8xf32> to vector<2x8x8xf32>
    %52 = vector.extract_strided_slice %7 {offsets = [0, 80], sizes = [16, 8], strides = [1, 1]} : vector<16x96xf32> to vector<16x8xf32>
    %53 = vector.shape_cast %52 : vector<16x8xf32> to vector<2x8x8xf32>
    "tpu.trace_start"() <{level = 10 : i32, message = "bqd,bkd->bqk"}> : () -> ()
    %cst_17 = arith.constant dense<0.000000e+00> : vector<2x8x8xf32>
    %54 = tpu.matmul %49, %51, %cst_17 {dimension_numbers = #tpu.dot_dimension_numbers<[2], [2], [1], [1], [0, 0, 0, 1, 1, 1], [0], [0]>} : vector<2x8x8xf32>, vector<2x8x8xf32>, vector<2x8x8xf32> -> vector<2x8x8xf32>
    "tpu.trace_stop"() : () -> ()
    %cst_18 = arith.constant 0.353553385 : f32
    %55 = vector.broadcast %cst_18 : f32 to vector<2x8x8xf32>
    %56 = arith.mulf %54, %55 : vector<2x8x8xf32>
    %cst_19 = arith.constant dense<0xFF800000> : vector<2x8xf32>
    %57 = vector.multi_reduction <maximumf>, %56, %cst_19 [2] : vector<2x8x8xf32> to vector<2x8xf32>
    %58 = vector.shape_cast %57 : vector<2x8xf32> to vector<2x8x1xf32>
    %59 = vector.broadcast %58 : vector<2x8x1xf32> to vector<2x8x8xf32>
    %60 = arith.subf %56, %59 : vector<2x8x8xf32>
    %61 = math.exp %60 : vector<2x8x8xf32>
    %cst_20 = arith.constant dense<0.000000e+00> : vector<2x8xf32>
    %62 = vector.multi_reduction <add>, %61, %cst_20 [2] : vector<2x8x8xf32> to vector<2x8xf32>
    %63 = vector.shape_cast %62 : vector<2x8xf32> to vector<2x8x1xf32>
    %64 = vector.broadcast %63 : vector<2x8x1xf32> to vector<2x8x8xf32>
    %65 = arith.divf %61, %64 : vector<2x8x8xf32>
    "tpu.trace_start"() <{level = 10 : i32, message = "bqk,bkd->bqd"}> : () -> ()
    %cst_21 = arith.constant dense<0.000000e+00> : vector<2x8x8xf32>
    %66 = tpu.matmul %65, %53, %cst_21 {dimension_numbers = #tpu.dot_dimension_numbers<[2], [1], [1], [2], [0, 0, 0, 1, 1, 2], [0], [0]>} : vector<2x8x8xf32>, vector<2x8x8xf32>, vector<2x8x8xf32> -> vector<2x8x8xf32>
    "tpu.trace_stop"() : () -> ()
    %67 = vector.shape_cast %66 : vector<2x8x8xf32> to vector<16x8xf32>
    %68 = vector.extract_strided_slice %7 {offsets = [0, 24], sizes = [16, 8], strides = [1, 1]} : vector<16x96xf32> to vector<16x8xf32>
    %69 = vector.shape_cast %68 : vector<16x8xf32> to vector<2x8x8xf32>
    %70 = vector.extract_strided_slice %7 {offsets = [0, 56], sizes = [16, 8], strides = [1, 1]} : vector<16x96xf32> to vector<16x8xf32>
    %71 = vector.shape_cast %70 : vector<16x8xf32> to vector<2x8x8xf32>
    %72 = vector.extract_strided_slice %7 {offsets = [0, 88], sizes = [16, 8], strides = [1, 1]} : vector<16x96xf32> to vector<16x8xf32>
    %73 = vector.shape_cast %72 : vector<16x8xf32> to vector<2x8x8xf32>
    "tpu.trace_start"() <{level = 10 : i32, message = "bqd,bkd->bqk"}> : () -> ()
    %cst_22 = arith.constant dense<0.000000e+00> : vector<2x8x8xf32>
    %74 = tpu.matmul %69, %71, %cst_22 {dimension_numbers = #tpu.dot_dimension_numbers<[2], [2], [1], [1], [0, 0, 0, 1, 1, 1], [0], [0]>} : vector<2x8x8xf32>, vector<2x8x8xf32>, vector<2x8x8xf32> -> vector<2x8x8xf32>
    "tpu.trace_stop"() : () -> ()
    %cst_23 = arith.constant 0.353553385 : f32
    %75 = vector.broadcast %cst_23 : f32 to vector<2x8x8xf32>
    %76 = arith.mulf %74, %75 : vector<2x8x8xf32>
    %cst_24 = arith.constant dense<0xFF800000> : vector<2x8xf32>
    %77 = vector.multi_reduction <maximumf>, %76, %cst_24 [2] : vector<2x8x8xf32> to vector<2x8xf32>
    %78 = vector.shape_cast %77 : vector<2x8xf32> to vector<2x8x1xf32>
    %79 = vector.broadcast %78 : vector<2x8x1xf32> to vector<2x8x8xf32>
    %80 = arith.subf %76, %79 : vector<2x8x8xf32>
    %81 = math.exp %80 : vector<2x8x8xf32>
    %cst_25 = arith.constant dense<0.000000e+00> : vector<2x8xf32>
    %82 = vector.multi_reduction <add>, %81, %cst_25 [2] : vector<2x8x8xf32> to vector<2x8xf32>
    %83 = vector.shape_cast %82 : vector<2x8xf32> to vector<2x8x1xf32>
    %84 = vector.broadcast %83 : vector<2x8x1xf32> to vector<2x8x8xf32>
    %85 = arith.divf %81, %84 : vector<2x8x8xf32>
    "tpu.trace_start"() <{level = 10 : i32, message = "bqk,bkd->bqd"}> : () -> ()
    %cst_26 = arith.constant dense<0.000000e+00> : vector<2x8x8xf32>
    %86 = tpu.matmul %85, %73, %cst_26 {dimension_numbers = #tpu.dot_dimension_numbers<[2], [1], [1], [2], [0, 0, 0, 1, 1, 2], [0], [0]>} : vector<2x8x8xf32>, vector<2x8x8xf32>, vector<2x8x8xf32> -> vector<2x8x8xf32>
    "tpu.trace_stop"() : () -> ()
    %87 = vector.shape_cast %86 : vector<2x8x8xf32> to vector<16x8xf32>
    %88 = tpu.concatenate %27, %47, %67, %87 in 1 : vector<16x8xf32>, vector<16x8xf32>, vector<16x8xf32>, vector<16x8xf32> -> vector<16x32xf32>
    %c0_27 = arith.constant 0 : index
    %c0_28 = arith.constant 0 : index
    %c0_29 = arith.constant 0 : index
    %89 = vector.load %arg3[%c0_27, %c0_28, %c0_29] : memref<2x32x32xf32, #tpu.memory_space<vmem>>, vector<1x32x32xf32>
    %90 = vector.shape_cast %89 : vector<1x32x32xf32> to vector<32x32xf32>
    %cst_30 = arith.constant dense<0.000000e+00> : vector<16x32xf32>
    %91 = tpu.matmul %88, %90, %cst_30 {dimension_numbers = #tpu.dot_dimension_numbers<[1], [0], [0], [1], [0, 0, 1, 1], [], []>} : vector<16x32xf32>, vector<32x32xf32>, vector<16x32xf32> -> vector<16x32xf32>
    %c0_31 = arith.constant 0 : index
    %c0_32 = arith.constant 0 : index
    %c0_33 = arith.constant 0 : index
    %92 = vector.load %arg4[%c0_31, %c0_32, %c0_33] : memref<2x1x32xf32, #tpu.memory_space<vmem>>, vector<1x1x32xf32>
    %93 = vector.shape_cast %92 : vector<1x1x32xf32> to vector<1x32xf32>
    %94 = vector.broadcast %93 : vector<1x32xf32> to vector<16x32xf32>
    %95 = arith.addf %91, %94 : vector<16x32xf32>
    %96 = arith.addf %0, %95 : vector<16x32xf32>
    %c0_34 = arith.constant 0 : index
    %c0_35 = arith.constant 0 : index
    %c0_36 = arith.constant 0 : index
    %97 = vector.load %arg9[%c0_34, %c0_35, %c0_36] : memref<2x1x32xf32, #tpu.memory_space<vmem>>, vector<1x1x32xf32>
    %98 = vector.shape_cast %97 : vector<1x1x32xf32> to vector<1x32xf32>
    %c0_37 = arith.constant 0 : index
    %c0_38 = arith.constant 0 : index
    %c0_39 = arith.constant 0 : index
    %99 = vector.load %arg10[%c0_37, %c0_38, %c0_39] : memref<2x1x32xf32, #tpu.memory_space<vmem>>, vector<1x1x32xf32>
    %100 = vector.shape_cast %99 : vector<1x1x32xf32> to vector<1x32xf32>
    %cst_40 = arith.constant dense<0.000000e+00> : vector<16xf32>
    %101 = vector.multi_reduction <add>, %96, %cst_40 [1] : vector<16x32xf32> to vector<16xf32>
    %102 = vector.shape_cast %101 : vector<16xf32> to vector<16x1xf32>
    %cst_41 = arith.constant 3.200000e+01 : f32
    %103 = vector.broadcast %cst_41 : f32 to vector<16x1xf32>
    %104 = arith.divf %102, %103 : vector<16x1xf32>
    %105 = vector.broadcast %104 : vector<16x1xf32> to vector<16x32xf32>
    %106 = arith.subf %96, %105 : vector<16x32xf32>
    %107 = arith.mulf %106, %106 : vector<16x32xf32>
    %cst_42 = arith.constant dense<0.000000e+00> : vector<16xf32>
    %108 = vector.multi_reduction <add>, %107, %cst_42 [1] : vector<16x32xf32> to vector<16xf32>
    %109 = vector.shape_cast %108 : vector<16xf32> to vector<16x1xf32>
    %cst_43 = arith.constant 3.200000e+01 : f32
    %110 = vector.broadcast %cst_43 : f32 to vector<16x1xf32>
    %111 = arith.divf %109, %110 : vector<16x1xf32>
    %112 = vector.broadcast %104 : vector<16x1xf32> to vector<16x32xf32>
    %113 = arith.subf %96, %112 : vector<16x32xf32>
    %cst_44 = arith.constant 9.99999974E-6 : f32
    %114 = vector.broadcast %cst_44 : f32 to vector<16x1xf32>
    %115 = arith.addf %111, %114 : vector<16x1xf32>
    %116 = math.rsqrt %115 : vector<16x1xf32>
    %117 = vector.broadcast %116 : vector<16x1xf32> to vector<16x32xf32>
    %118 = arith.mulf %113, %117 : vector<16x32xf32>
    %119 = vector.broadcast %98 : vector<1x32xf32> to vector<16x32xf32>
    %120 = arith.mulf %118, %119 : vector<16x32xf32>
    %121 = vector.broadcast %100 : vector<1x32xf32> to vector<16x32xf32>
    %122 = arith.addf %120, %121 : vector<16x32xf32>
    %c0_45 = arith.constant 0 : index
    %c0_46 = arith.constant 0 : index
    %c0_47 = arith.constant 0 : index
    %123 = vector.load %arg5[%c0_45, %c0_46, %c0_47] : memref<2x32x64xf32, #tpu.memory_space<vmem>>, vector<1x32x64xf32>
    %124 = vector.shape_cast %123 : vector<1x32x64xf32> to vector<32x64xf32>
    %cst_48 = arith.constant dense<0.000000e+00> : vector<16x64xf32>
    %125 = tpu.matmul %122, %124, %cst_48 {dimension_numbers = #tpu.dot_dimension_numbers<[1], [0], [0], [1], [0, 0, 1, 1], [], []>} : vector<16x32xf32>, vector<32x64xf32>, vector<16x64xf32> -> vector<16x64xf32>
    %c0_49 = arith.constant 0 : index
    %c0_50 = arith.constant 0 : index
    %c0_51 = arith.constant 0 : index
    %126 = vector.load %arg6[%c0_49, %c0_50, %c0_51] : memref<2x1x64xf32, #tpu.memory_space<vmem>>, vector<1x1x64xf32>
    %127 = vector.shape_cast %126 : vector<1x1x64xf32> to vector<1x64xf32>
    %128 = vector.broadcast %127 : vector<1x64xf32> to vector<16x64xf32>
    %129 = arith.addf %125, %128 : vector<16x64xf32>
    %cst_52 = arith.constant 0.000000e+00 : f32
    %130 = vector.broadcast %cst_52 : f32 to vector<16x64xf32>
    %131 = arith.maximumf %129, %130 : vector<16x64xf32>
    %c0_53 = arith.constant 0 : index
    %c0_54 = arith.constant 0 : index
    %c0_55 = arith.constant 0 : index
    %132 = vector.load %arg7[%c0_53, %c0_54, %c0_55] : memref<2x64x32xf32, #tpu.memory_space<vmem>>, vector<1x64x32xf32>
    %133 = vector.shape_cast %132 : vector<1x64x32xf32> to vector<64x32xf32>
    %cst_56 = arith.constant dense<0.000000e+00> : vector<16x32xf32>
    %134 = tpu.matmul %131, %133, %cst_56 {dimension_numbers = #tpu.dot_dimension_numbers<[1], [0], [0], [1], [0, 0, 1, 1], [], []>} : vector<16x64xf32>, vector<64x32xf32>, vector<16x32xf32> -> vector<16x32xf32>
    %c0_57 = arith.constant 0 : index
    %c0_58 = arith.constant 0 : index
    %c0_59 = arith.constant 0 : index
    %135 = vector.load %arg8[%c0_57, %c0_58, %c0_59] : memref<2x1x32xf32, #tpu.memory_space<vmem>>, vector<1x1x32xf32>
    %136 = vector.shape_cast %135 : vector<1x1x32xf32> to vector<1x32xf32>
    %137 = vector.broadcast %136 : vector<1x32xf32> to vector<16x32xf32>
    %138 = arith.addf %134, %137 : vector<16x32xf32>
    %139 = arith.addf %122, %138 : vector<16x32xf32>
    %c0_60 = arith.constant 0 : index
    %c0_61 = arith.constant 0 : index
    %c0_62 = arith.constant 0 : index
    %140 = vector.load %arg11[%c0_60, %c0_61, %c0_62] : memref<2x1x32xf32, #tpu.memory_space<vmem>>, vector<1x1x32xf32>
    %141 = vector.shape_cast %140 : vector<1x1x32xf32> to vector<1x32xf32>
    %c0_63 = arith.constant 0 : index
    %c0_64 = arith.constant 0 : index
    %c0_65 = arith.constant 0 : index
    %142 = vector.load %arg12[%c0_63, %c0_64, %c0_65] : memref<2x1x32xf32, #tpu.memory_space<vmem>>, vector<1x1x32xf32>
    %143 = vector.shape_cast %142 : vector<1x1x32xf32> to vector<1x32xf32>
    %cst_66 = arith.constant dense<0.000000e+00> : vector<16xf32>
    %144 = vector.multi_reduction <add>, %139, %cst_66 [1] : vector<16x32xf32> to vector<16xf32>
    %145 = vector.shape_cast %144 : vector<16xf32> to vector<16x1xf32>
    %cst_67 = arith.constant 3.200000e+01 : f32
    %146 = vector.broadcast %cst_67 : f32 to vector<16x1xf32>
    %147 = arith.divf %145, %146 : vector<16x1xf32>
    %148 = vector.broadcast %147 : vector<16x1xf32> to vector<16x32xf32>
    %149 = arith.subf %139, %148 : vector<16x32xf32>
    %150 = arith.mulf %149, %149 : vector<16x32xf32>
    %cst_68 = arith.constant dense<0.000000e+00> : vector<16xf32>
    %151 = vector.multi_reduction <add>, %150, %cst_68 [1] : vector<16x32xf32> to vector<16xf32>
    %152 = vector.shape_cast %151 : vector<16xf32> to vector<16x1xf32>
    %cst_69 = arith.constant 3.200000e+01 : f32
    %153 = vector.broadcast %cst_69 : f32 to vector<16x1xf32>
    %154 = arith.divf %152, %153 : vector<16x1xf32>
    %155 = vector.broadcast %147 : vector<16x1xf32> to vector<16x32xf32>
    %156 = arith.subf %139, %155 : vector<16x32xf32>
    %cst_70 = arith.constant 9.99999974E-6 : f32
    %157 = vector.broadcast %cst_70 : f32 to vector<16x1xf32>
    %158 = arith.addf %154, %157 : vector<16x1xf32>
    %159 = math.rsqrt %158 : vector<16x1xf32>
    %160 = vector.broadcast %159 : vector<16x1xf32> to vector<16x32xf32>
    %161 = arith.mulf %156, %160 : vector<16x32xf32>
    %162 = vector.broadcast %141 : vector<1x32xf32> to vector<16x32xf32>
    %163 = arith.mulf %161, %162 : vector<16x32xf32>
    %164 = vector.broadcast %143 : vector<1x32xf32> to vector<16x32xf32>
    %165 = arith.addf %163, %164 : vector<16x32xf32>
    %c1 = arith.constant 1 : index
    %c0_71 = arith.constant 0 : index
    %c0_72 = arith.constant 0 : index
    %166 = vector.load %arg1[%c1, %c0_71, %c0_72] : memref<2x32x96xf32, #tpu.memory_space<vmem>>, vector<1x32x96xf32>
    %167 = vector.shape_cast %166 : vector<1x32x96xf32> to vector<32x96xf32>
    %cst_73 = arith.constant dense<0.000000e+00> : vector<16x96xf32>
    %168 = tpu.matmul %165, %167, %cst_73 {dimension_numbers = #tpu.dot_dimension_numbers<[1], [0], [0], [1], [0, 0, 1, 1], [], []>} : vector<16x32xf32>, vector<32x96xf32>, vector<16x96xf32> -> vector<16x96xf32>
    %c1_74 = arith.constant 1 : index
    %c0_75 = arith.constant 0 : index
    %c0_76 = arith.constant 0 : index
    %169 = vector.load %arg2[%c1_74, %c0_75, %c0_76] : memref<2x1x96xf32, #tpu.memory_space<vmem>>, vector<1x1x96xf32>
    %170 = vector.shape_cast %169 : vector<1x1x96xf32> to vector<1x96xf32>
    %171 = vector.broadcast %170 : vector<1x96xf32> to vector<16x96xf32>
    %172 = arith.addf %168, %171 : vector<16x96xf32>
    %173 = vector.extract_strided_slice %172 {offsets = [0, 0], sizes = [16, 8], strides = [1, 1]} : vector<16x96xf32> to vector<16x8xf32>
    %174 = vector.shape_cast %173 : vector<16x8xf32> to vector<2x8x8xf32>
    %175 = vector.extract_strided_slice %172 {offsets = [0, 32], sizes = [16, 8], strides = [1, 1]} : vector<16x96xf32> to vector<16x8xf32>
    %176 = vector.shape_cast %175 : vector<16x8xf32> to vector<2x8x8xf32>
    %177 = vector.extract_strided_slice %172 {offsets = [0, 64], sizes = [16, 8], strides = [1, 1]} : vector<16x96xf32> to vector<16x8xf32>
    %178 = vector.shape_cast %177 : vector<16x8xf32> to vector<2x8x8xf32>
    "tpu.trace_start"() <{level = 10 : i32, message = "bqd,bkd->bqk"}> : () -> ()
    %cst_77 = arith.constant dense<0.000000e+00> : vector<2x8x8xf32>
    %179 = tpu.matmul %174, %176, %cst_77 {dimension_numbers = #tpu.dot_dimension_numbers<[2], [2], [1], [1], [0, 0, 0, 1, 1, 1], [0], [0]>} : vector<2x8x8xf32>, vector<2x8x8xf32>, vector<2x8x8xf32> -> vector<2x8x8xf32>
    "tpu.trace_stop"() : () -> ()
    %cst_78 = arith.constant 0.353553385 : f32
    %180 = vector.broadcast %cst_78 : f32 to vector<2x8x8xf32>
    %181 = arith.mulf %179, %180 : vector<2x8x8xf32>
    %cst_79 = arith.constant dense<0xFF800000> : vector<2x8xf32>
    %182 = vector.multi_reduction <maximumf>, %181, %cst_79 [2] : vector<2x8x8xf32> to vector<2x8xf32>
    %183 = vector.shape_cast %182 : vector<2x8xf32> to vector<2x8x1xf32>
    %184 = vector.broadcast %183 : vector<2x8x1xf32> to vector<2x8x8xf32>
    %185 = arith.subf %181, %184 : vector<2x8x8xf32>
    %186 = math.exp %185 : vector<2x8x8xf32>
    %cst_80 = arith.constant dense<0.000000e+00> : vector<2x8xf32>
    %187 = vector.multi_reduction <add>, %186, %cst_80 [2] : vector<2x8x8xf32> to vector<2x8xf32>
    %188 = vector.shape_cast %187 : vector<2x8xf32> to vector<2x8x1xf32>
    %189 = vector.broadcast %188 : vector<2x8x1xf32> to vector<2x8x8xf32>
    %190 = arith.divf %186, %189 : vector<2x8x8xf32>
    "tpu.trace_start"() <{level = 10 : i32, message = "bqk,bkd->bqd"}> : () -> ()
    %cst_81 = arith.constant dense<0.000000e+00> : vector<2x8x8xf32>
    %191 = tpu.matmul %190, %178, %cst_81 {dimension_numbers = #tpu.dot_dimension_numbers<[2], [1], [1], [2], [0, 0, 0, 1, 1, 2], [0], [0]>} : vector<2x8x8xf32>, vector<2x8x8xf32>, vector<2x8x8xf32> -> vector<2x8x8xf32>
    "tpu.trace_stop"() : () -> ()
    %192 = vector.shape_cast %191 : vector<2x8x8xf32> to vector<16x8xf32>
    %193 = vector.extract_strided_slice %172 {offsets = [0, 8], sizes = [16, 8], strides = [1, 1]} : vector<16x96xf32> to vector<16x8xf32>
    %194 = vector.shape_cast %193 : vector<16x8xf32> to vector<2x8x8xf32>
    %195 = vector.extract_strided_slice %172 {offsets = [0, 40], sizes = [16, 8], strides = [1, 1]} : vector<16x96xf32> to vector<16x8xf32>
    %196 = vector.shape_cast %195 : vector<16x8xf32> to vector<2x8x8xf32>
    %197 = vector.extract_strided_slice %172 {offsets = [0, 72], sizes = [16, 8], strides = [1, 1]} : vector<16x96xf32> to vector<16x8xf32>
    %198 = vector.shape_cast %197 : vector<16x8xf32> to vector<2x8x8xf32>
    "tpu.trace_start"() <{level = 10 : i32, message = "bqd,bkd->bqk"}> : () -> ()
    %cst_82 = arith.constant dense<0.000000e+00> : vector<2x8x8xf32>
    %199 = tpu.matmul %194, %196, %cst_82 {dimension_numbers = #tpu.dot_dimension_numbers<[2], [2], [1], [1], [0, 0, 0, 1, 1, 1], [0], [0]>} : vector<2x8x8xf32>, vector<2x8x8xf32>, vector<2x8x8xf32> -> vector<2x8x8xf32>
    "tpu.trace_stop"() : () -> ()
    %cst_83 = arith.constant 0.353553385 : f32
    %200 = vector.broadcast %cst_83 : f32 to vector<2x8x8xf32>
    %201 = arith.mulf %199, %200 : vector<2x8x8xf32>
    %cst_84 = arith.constant dense<0xFF800000> : vector<2x8xf32>
    %202 = vector.multi_reduction <maximumf>, %201, %cst_84 [2] : vector<2x8x8xf32> to vector<2x8xf32>
    %203 = vector.shape_cast %202 : vector<2x8xf32> to vector<2x8x1xf32>
    %204 = vector.broadcast %203 : vector<2x8x1xf32> to vector<2x8x8xf32>
    %205 = arith.subf %201, %204 : vector<2x8x8xf32>
    %206 = math.exp %205 : vector<2x8x8xf32>
    %cst_85 = arith.constant dense<0.000000e+00> : vector<2x8xf32>
    %207 = vector.multi_reduction <add>, %206, %cst_85 [2] : vector<2x8x8xf32> to vector<2x8xf32>
    %208 = vector.shape_cast %207 : vector<2x8xf32> to vector<2x8x1xf32>
    %209 = vector.broadcast %208 : vector<2x8x1xf32> to vector<2x8x8xf32>
    %210 = arith.divf %206, %209 : vector<2x8x8xf32>
    "tpu.trace_start"() <{level = 10 : i32, message = "bqk,bkd->bqd"}> : () -> ()
    %cst_86 = arith.constant dense<0.000000e+00> : vector<2x8x8xf32>
    %211 = tpu.matmul %210, %198, %cst_86 {dimension_numbers = #tpu.dot_dimension_numbers<[2], [1], [1], [2], [0, 0, 0, 1, 1, 2], [0], [0]>} : vector<2x8x8xf32>, vector<2x8x8xf32>, vector<2x8x8xf32> -> vector<2x8x8xf32>
    "tpu.trace_stop"() : () -> ()
    %212 = vector.shape_cast %211 : vector<2x8x8xf32> to vector<16x8xf32>
    %213 = vector.extract_strided_slice %172 {offsets = [0, 16], sizes = [16, 8], strides = [1, 1]} : vector<16x96xf32> to vector<16x8xf32>
    %214 = vector.shape_cast %213 : vector<16x8xf32> to vector<2x8x8xf32>
    %215 = vector.extract_strided_slice %172 {offsets = [0, 48], sizes = [16, 8], strides = [1, 1]} : vector<16x96xf32> to vector<16x8xf32>
    %216 = vector.shape_cast %215 : vector<16x8xf32> to vector<2x8x8xf32>
    %217 = vector.extract_strided_slice %172 {offsets = [0, 80], sizes = [16, 8], strides = [1, 1]} : vector<16x96xf32> to vector<16x8xf32>
    %218 = vector.shape_cast %217 : vector<16x8xf32> to vector<2x8x8xf32>
    "tpu.trace_start"() <{level = 10 : i32, message = "bqd,bkd->bqk"}> : () -> ()
    %cst_87 = arith.constant dense<0.000000e+00> : vector<2x8x8xf32>
    %219 = tpu.matmul %214, %216, %cst_87 {dimension_numbers = #tpu.dot_dimension_numbers<[2], [2], [1], [1], [0, 0, 0, 1, 1, 1], [0], [0]>} : vector<2x8x8xf32>, vector<2x8x8xf32>, vector<2x8x8xf32> -> vector<2x8x8xf32>
    "tpu.trace_stop"() : () -> ()
    %cst_88 = arith.constant 0.353553385 : f32
    %220 = vector.broadcast %cst_88 : f32 to vector<2x8x8xf32>
    %221 = arith.mulf %219, %220 : vector<2x8x8xf32>
    %cst_89 = arith.constant dense<0xFF800000> : vector<2x8xf32>
    %222 = vector.multi_reduction <maximumf>, %221, %cst_89 [2] : vector<2x8x8xf32> to vector<2x8xf32>
    %223 = vector.shape_cast %222 : vector<2x8xf32> to vector<2x8x1xf32>
    %224 = vector.broadcast %223 : vector<2x8x1xf32> to vector<2x8x8xf32>
    %225 = arith.subf %221, %224 : vector<2x8x8xf32>
    %226 = math.exp %225 : vector<2x8x8xf32>
    %cst_90 = arith.constant dense<0.000000e+00> : vector<2x8xf32>
    %227 = vector.multi_reduction <add>, %226, %cst_90 [2] : vector<2x8x8xf32> to vector<2x8xf32>
    %228 = vector.shape_cast %227 : vector<2x8xf32> to vector<2x8x1xf32>
    %229 = vector.broadcast %228 : vector<2x8x1xf32> to vector<2x8x8xf32>
    %230 = arith.divf %226, %229 : vector<2x8x8xf32>
    "tpu.trace_start"() <{level = 10 : i32, message = "bqk,bkd->bqd"}> : () -> ()
    %cst_91 = arith.constant dense<0.000000e+00> : vector<2x8x8xf32>
    %231 = tpu.matmul %230, %218, %cst_91 {dimension_numbers = #tpu.dot_dimension_numbers<[2], [1], [1], [2], [0, 0, 0, 1, 1, 2], [0], [0]>} : vector<2x8x8xf32>, vector<2x8x8xf32>, vector<2x8x8xf32> -> vector<2x8x8xf32>
    "tpu.trace_stop"() : () -> ()
    %232 = vector.shape_cast %231 : vector<2x8x8xf32> to vector<16x8xf32>
    %233 = vector.extract_strided_slice %172 {offsets = [0, 24], sizes = [16, 8], strides = [1, 1]} : vector<16x96xf32> to vector<16x8xf32>
    %234 = vector.shape_cast %233 : vector<16x8xf32> to vector<2x8x8xf32>
    %235 = vector.extract_strided_slice %172 {offsets = [0, 56], sizes = [16, 8], strides = [1, 1]} : vector<16x96xf32> to vector<16x8xf32>
    %236 = vector.shape_cast %235 : vector<16x8xf32> to vector<2x8x8xf32>
    %237 = vector.extract_strided_slice %172 {offsets = [0, 88], sizes = [16, 8], strides = [1, 1]} : vector<16x96xf32> to vector<16x8xf32>
    %238 = vector.shape_cast %237 : vector<16x8xf32> to vector<2x8x8xf32>
    "tpu.trace_start"() <{level = 10 : i32, message = "bqd,bkd->bqk"}> : () -> ()
    %cst_92 = arith.constant dense<0.000000e+00> : vector<2x8x8xf32>
    %239 = tpu.matmul %234, %236, %cst_92 {dimension_numbers = #tpu.dot_dimension_numbers<[2], [2], [1], [1], [0, 0, 0, 1, 1, 1], [0], [0]>} : vector<2x8x8xf32>, vector<2x8x8xf32>, vector<2x8x8xf32> -> vector<2x8x8xf32>
    "tpu.trace_stop"() : () -> ()
    %cst_93 = arith.constant 0.353553385 : f32
    %240 = vector.broadcast %cst_93 : f32 to vector<2x8x8xf32>
    %241 = arith.mulf %239, %240 : vector<2x8x8xf32>
    %cst_94 = arith.constant dense<0xFF800000> : vector<2x8xf32>
    %242 = vector.multi_reduction <maximumf>, %241, %cst_94 [2] : vector<2x8x8xf32> to vector<2x8xf32>
    %243 = vector.shape_cast %242 : vector<2x8xf32> to vector<2x8x1xf32>
    %244 = vector.broadcast %243 : vector<2x8x1xf32> to vector<2x8x8xf32>
    %245 = arith.subf %241, %244 : vector<2x8x8xf32>
    %246 = math.exp %245 : vector<2x8x8xf32>
    %cst_95 = arith.constant dense<0.000000e+00> : vector<2x8xf32>
    %247 = vector.multi_reduction <add>, %246, %cst_95 [2] : vector<2x8x8xf32> to vector<2x8xf32>
    %248 = vector.shape_cast %247 : vector<2x8xf32> to vector<2x8x1xf32>
    %249 = vector.broadcast %248 : vector<2x8x1xf32> to vector<2x8x8xf32>
    %250 = arith.divf %246, %249 : vector<2x8x8xf32>
    "tpu.trace_start"() <{level = 10 : i32, message = "bqk,bkd->bqd"}> : () -> ()
    %cst_96 = arith.constant dense<0.000000e+00> : vector<2x8x8xf32>
    %251 = tpu.matmul %250, %238, %cst_96 {dimension_numbers = #tpu.dot_dimension_numbers<[2], [1], [1], [2], [0, 0, 0, 1, 1, 2], [0], [0]>} : vector<2x8x8xf32>, vector<2x8x8xf32>, vector<2x8x8xf32> -> vector<2x8x8xf32>
    "tpu.trace_stop"() : () -> ()
    %252 = vector.shape_cast %251 : vector<2x8x8xf32> to vector<16x8xf32>
    %253 = tpu.concatenate %192, %212, %232, %252 in 1 : vector<16x8xf32>, vector<16x8xf32>, vector<16x8xf32>, vector<16x8xf32> -> vector<16x32xf32>
    %c1_97 = arith.constant 1 : index
    %c0_98 = arith.constant 0 : index
    %c0_99 = arith.constant 0 : index
    %254 = vector.load %arg3[%c1_97, %c0_98, %c0_99] : memref<2x32x32xf32, #tpu.memory_space<vmem>>, vector<1x32x32xf32>
    %255 = vector.shape_cast %254 : vector<1x32x32xf32> to vector<32x32xf32>
    %cst_100 = arith.constant dense<0.000000e+00> : vector<16x32xf32>
    %256 = tpu.matmul %253, %255, %cst_100 {dimension_numbers = #tpu.dot_dimension_numbers<[1], [0], [0], [1], [0, 0, 1, 1], [], []>} : vector<16x32xf32>, vector<32x32xf32>, vector<16x32xf32> -> vector<16x32xf32>
    %c1_101 = arith.constant 1 : index
    %c0_102 = arith.constant 0 : index
    %c0_103 = arith.constant 0 : index
    %257 = vector.load %arg4[%c1_101, %c0_102, %c0_103] : memref<2x1x32xf32, #tpu.memory_space<vmem>>, vector<1x1x32xf32>
    %258 = vector.shape_cast %257 : vector<1x1x32xf32> to vector<1x32xf32>
    %259 = vector.broadcast %258 : vector<1x32xf32> to vector<16x32xf32>
    %260 = arith.addf %256, %259 : vector<16x32xf32>
    %261 = arith.addf %165, %260 : vector<16x32xf32>
    %c1_104 = arith.constant 1 : index
    %c0_105 = arith.constant 0 : index
    %c0_106 = arith.constant 0 : index
    %262 = vector.load %arg9[%c1_104, %c0_105, %c0_106] : memref<2x1x32xf32, #tpu.memory_space<vmem>>, vector<1x1x32xf32>
    %263 = vector.shape_cast %262 : vector<1x1x32xf32> to vector<1x32xf32>
    %c1_107 = arith.constant 1 : index
    %c0_108 = arith.constant 0 : index
    %c0_109 = arith.constant 0 : index
    %264 = vector.load %arg10[%c1_107, %c0_108, %c0_109] : memref<2x1x32xf32, #tpu.memory_space<vmem>>, vector<1x1x32xf32>
    %265 = vector.shape_cast %264 : vector<1x1x32xf32> to vector<1x32xf32>
    %cst_110 = arith.constant dense<0.000000e+00> : vector<16xf32>
    %266 = vector.multi_reduction <add>, %261, %cst_110 [1] : vector<16x32xf32> to vector<16xf32>
    %267 = vector.shape_cast %266 : vector<16xf32> to vector<16x1xf32>
    %cst_111 = arith.constant 3.200000e+01 : f32
    %268 = vector.broadcast %cst_111 : f32 to vector<16x1xf32>
    %269 = arith.divf %267, %268 : vector<16x1xf32>
    %270 = vector.broadcast %269 : vector<16x1xf32> to vector<16x32xf32>
    %271 = arith.subf %261, %270 : vector<16x32xf32>
    %272 = arith.mulf %271, %271 : vector<16x32xf32>
    %cst_112 = arith.constant dense<0.000000e+00> : vector<16xf32>
    %273 = vector.multi_reduction <add>, %272, %cst_112 [1] : vector<16x32xf32> to vector<16xf32>
    %274 = vector.shape_cast %273 : vector<16xf32> to vector<16x1xf32>
    %cst_113 = arith.constant 3.200000e+01 : f32
    %275 = vector.broadcast %cst_113 : f32 to vector<16x1xf32>
    %276 = arith.divf %274, %275 : vector<16x1xf32>
    %277 = vector.broadcast %269 : vector<16x1xf32> to vector<16x32xf32>
    %278 = arith.subf %261, %277 : vector<16x32xf32>
    %cst_114 = arith.constant 9.99999974E-6 : f32
    %279 = vector.broadcast %cst_114 : f32 to vector<16x1xf32>
    %280 = arith.addf %276, %279 : vector<16x1xf32>
    %281 = math.rsqrt %280 : vector<16x1xf32>
    %282 = vector.broadcast %281 : vector<16x1xf32> to vector<16x32xf32>
    %283 = arith.mulf %278, %282 : vector<16x32xf32>
    %284 = vector.broadcast %263 : vector<1x32xf32> to vector<16x32xf32>
    %285 = arith.mulf %283, %284 : vector<16x32xf32>
    %286 = vector.broadcast %265 : vector<1x32xf32> to vector<16x32xf32>
    %287 = arith.addf %285, %286 : vector<16x32xf32>
    %c1_115 = arith.constant 1 : index
    %c0_116 = arith.constant 0 : index
    %c0_117 = arith.constant 0 : index
    %288 = vector.load %arg5[%c1_115, %c0_116, %c0_117] : memref<2x32x64xf32, #tpu.memory_space<vmem>>, vector<1x32x64xf32>
    %289 = vector.shape_cast %288 : vector<1x32x64xf32> to vector<32x64xf32>
    %cst_118 = arith.constant dense<0.000000e+00> : vector<16x64xf32>
    %290 = tpu.matmul %287, %289, %cst_118 {dimension_numbers = #tpu.dot_dimension_numbers<[1], [0], [0], [1], [0, 0, 1, 1], [], []>} : vector<16x32xf32>, vector<32x64xf32>, vector<16x64xf32> -> vector<16x64xf32>
    %c1_119 = arith.constant 1 : index
    %c0_120 = arith.constant 0 : index
    %c0_121 = arith.constant 0 : index
    %291 = vector.load %arg6[%c1_119, %c0_120, %c0_121] : memref<2x1x64xf32, #tpu.memory_space<vmem>>, vector<1x1x64xf32>
    %292 = vector.shape_cast %291 : vector<1x1x64xf32> to vector<1x64xf32>
    %293 = vector.broadcast %292 : vector<1x64xf32> to vector<16x64xf32>
    %294 = arith.addf %290, %293 : vector<16x64xf32>
    %cst_122 = arith.constant 0.000000e+00 : f32
    %295 = vector.broadcast %cst_122 : f32 to vector<16x64xf32>
    %296 = arith.maximumf %294, %295 : vector<16x64xf32>
    %c1_123 = arith.constant 1 : index
    %c0_124 = arith.constant 0 : index
    %c0_125 = arith.constant 0 : index
    %297 = vector.load %arg7[%c1_123, %c0_124, %c0_125] : memref<2x64x32xf32, #tpu.memory_space<vmem>>, vector<1x64x32xf32>
    %298 = vector.shape_cast %297 : vector<1x64x32xf32> to vector<64x32xf32>
    %cst_126 = arith.constant dense<0.000000e+00> : vector<16x32xf32>
    %299 = tpu.matmul %296, %298, %cst_126 {dimension_numbers = #tpu.dot_dimension_numbers<[1], [0], [0], [1], [0, 0, 1, 1], [], []>} : vector<16x64xf32>, vector<64x32xf32>, vector<16x32xf32> -> vector<16x32xf32>
    %c1_127 = arith.constant 1 : index
    %c0_128 = arith.constant 0 : index
    %c0_129 = arith.constant 0 : index
    %300 = vector.load %arg8[%c1_127, %c0_128, %c0_129] : memref<2x1x32xf32, #tpu.memory_space<vmem>>, vector<1x1x32xf32>
    %301 = vector.shape_cast %300 : vector<1x1x32xf32> to vector<1x32xf32>
    %302 = vector.broadcast %301 : vector<1x32xf32> to vector<16x32xf32>
    %303 = arith.addf %299, %302 : vector<16x32xf32>
    %304 = arith.addf %287, %303 : vector<16x32xf32>
    %c1_130 = arith.constant 1 : index
    %c0_131 = arith.constant 0 : index
    %c0_132 = arith.constant 0 : index
    %305 = vector.load %arg11[%c1_130, %c0_131, %c0_132] : memref<2x1x32xf32, #tpu.memory_space<vmem>>, vector<1x1x32xf32>
    %306 = vector.shape_cast %305 : vector<1x1x32xf32> to vector<1x32xf32>
    %c1_133 = arith.constant 1 : index
    %c0_134 = arith.constant 0 : index
    %c0_135 = arith.constant 0 : index
    %307 = vector.load %arg12[%c1_133, %c0_134, %c0_135] : memref<2x1x32xf32, #tpu.memory_space<vmem>>, vector<1x1x32xf32>
    %308 = vector.shape_cast %307 : vector<1x1x32xf32> to vector<1x32xf32>
    %cst_136 = arith.constant dense<0.000000e+00> : vector<16xf32>
    %309 = vector.multi_reduction <add>, %304, %cst_136 [1] : vector<16x32xf32> to vector<16xf32>
    %310 = vector.shape_cast %309 : vector<16xf32> to vector<16x1xf32>
    %cst_137 = arith.constant 3.200000e+01 : f32
    %311 = vector.broadcast %cst_137 : f32 to vector<16x1xf32>
    %312 = arith.divf %310, %311 : vector<16x1xf32>
    %313 = vector.broadcast %312 : vector<16x1xf32> to vector<16x32xf32>
    %314 = arith.subf %304, %313 : vector<16x32xf32>
    %315 = arith.mulf %314, %314 : vector<16x32xf32>
    %cst_138 = arith.constant dense<0.000000e+00> : vector<16xf32>
    %316 = vector.multi_reduction <add>, %315, %cst_138 [1] : vector<16x32xf32> to vector<16xf32>
    %317 = vector.shape_cast %316 : vector<16xf32> to vector<16x1xf32>
    %cst_139 = arith.constant 3.200000e+01 : f32
    %318 = vector.broadcast %cst_139 : f32 to vector<16x1xf32>
    %319 = arith.divf %317, %318 : vector<16x1xf32>
    %320 = vector.broadcast %312 : vector<16x1xf32> to vector<16x32xf32>
    %321 = arith.subf %304, %320 : vector<16x32xf32>
    %cst_140 = arith.constant 9.99999974E-6 : f32
    %322 = vector.broadcast %cst_140 : f32 to vector<16x1xf32>
    %323 = arith.addf %319, %322 : vector<16x1xf32>
    %324 = math.rsqrt %323 : vector<16x1xf32>
    %325 = vector.broadcast %324 : vector<16x1xf32> to vector<16x32xf32>
    %326 = arith.mulf %321, %325 : vector<16x32xf32>
    %327 = vector.broadcast %306 : vector<1x32xf32> to vector<16x32xf32>
    %328 = arith.mulf %326, %327 : vector<16x32xf32>
    %329 = vector.broadcast %308 : vector<1x32xf32> to vector<16x32xf32>
    %330 = arith.addf %328, %329 : vector<16x32xf32>
    %c0_141 = arith.constant 0 : index
    %c0_142 = arith.constant 0 : index
    %331 = vector.load %arg13[%c0_141, %c0_142] : memref<16x32xf32, #tpu.memory_space<vmem>>, vector<16x32xf32>
    tpu.vector_store %arg13[%c0_141, %c0_142], %330 {strides = array<i32>} : memref<16x32xf32, #tpu.memory_space<vmem>>, vector<16x32xf32>,
    return
  }
}

</mosaic_0001>

<bundles_post_ra>
// kernel: tpu_custom_call.1
= control target key start
LH: loop header
LB: loop body
LE: loop exit
PB: predicated region body
PF: predicated region fallthrough
CT: control target
= control target key end

     0   :  { %18 = vsyncpa [#allocation3], 0  ;;  %s5020_s0 = inlined_call_operand.hbm [shape: f32[16,32], index: 0, kind: input, shape index: {}]   ;;  %s5021_s1 = inlined_call_operand.vmem [shape: f32[2,32,96], index: 1, kind: input, shape index: {}]   ;;  %s5022_s2 = inlined_call_operand.vmem [shape: f32[2,1,96], index: 2, kind: input, shape index: {}]   ;;  %s5023_s3 = inlined_call_operand.vmem [shape: f32[2,32,32], index: 3, kind: input, shape index: {}]   ;;  %s5024_s4 = inlined_call_operand.vmem [shape: f32[2,1,32], index: 4, kind: input, shape index: {}]   ;;  %s5025_s5 = inlined_call_operand.vmem [shape: f32[2,32,64], index: 5, kind: input, shape index: {}]   ;;  %s5026_s6 = inlined_call_operand.vmem [shape: f32[2,1,64], index: 6, kind: input, shape index: {}]   ;;  %s5027_s7 = inlined_call_operand.vmem [shape: f32[2,64,32], index: 7, kind: input, shape index: {}]   ;;  %s5028_s8 = inlined_call_operand.vmem [shape: f32[2,1,32], index: 8, kind: input, shape index: {}]   ;;  %s5029_s9 = inlined_call_operand.vmem [shape: f32[2,1,32], index: 9, kind: input, shape index: {}]   ;;  %s5030_s10 = inlined_call_operand.vmem [shape: f32[2,1,32], index: 10, kind: input, shape index: {}]   ;;  %s5031_s11 = inlined_call_operand.vmem [shape: f32[2,1,32], index: 11, kind: input, shape index: {}]   ;;  %s5032_s12 = inlined_call_operand.vmem [shape: f32[2,1,32], index: 12, kind: input, shape index: {}]   ;;  %s5033_s13 = inlined_call_operand.hbm [shape: f32[16,32], index: 13, kind: output, shape index: {}]  }
   0x1   :  { %19 = vsyncpa [#allocation4], 0  ;;  %s4377_s25 = smov [#allocation2]  }
   0x2   :  { %s25_s26 = sshll.u32 %s4377_s25, 4  ;;  %s26_s26 = int_to_ptr.vmem [resolvable:$true] %s25_s26 }
   0x3   :  { %s4341_s27 = scalar_lea.vmem %s26_s26, 256  ;;  %p4346_p1 = scmp.lt.s32.totalorder %s26_s26, %s26_s26 }
   0x4   :  { %p4342_p0 = scmp.ne.s32.totalorder %s26_s26, %s4341_s27  ;;  %p4347_p2 = scmp.lt.s32.totalorder %s4341_s27, %s4341_s27 }
   0x6   :  { %p4348_p3 = por %p4347_p2, %p4346_p1 }
   0x8   :  { %p4349_p4 = pnand %p4348_p3, %p4342_p0 }
   0xa   :  { %4352 = shalt.err (!%p4349_p4)
}
   0xb   :  { %s5034_s28 = smov 128   ;;  %s5037_s29 = smov 8  }
   0xc   :  { %31 = dma.hbm_to_vmem [thread:$0]  %s5020_s0, 256, %s26_s26, [#allocation3], %s5034_s28, %s5034_s28, %s5037_s29  }
   0xd   :  { %4373 = dma.done.wait [#allocation3], 256  }
   0xe   :  { %4374 = vsyncadd [#allocation3], 4294967040  ;;  %vm72_vm0 = vcmask 261120   ;;  %v64_v0 = vld [vmem:[%s5021_s1 + $0x18] sm:$0xff]  ;;  %v63_v1 = vld [vmem:[%s5021_s1 + $0x10] sm:$0xff]  ;;  %v4380_v6 = vmov 0.0  }
   0xf   :  { %3970 = vmatprep.subr.mxu1 %v64_v0  ;;  %v4478_v2 = vld [vmem:[#allocation2] sm:$0xff]  ;;  %v62_v3 = vld [vmem:[%s5021_s1 + $0x8] sm:$0xff]  ;;  %3991 = vmatprep.subr.mxu0 %v4380_v6  ;;  %vm4381_vm1 = vmmov 0   ;;  %s4382_s24 = smov 96   ;;  %vm157_vm2 = vcmask 64512   ;;  %s4383_s25 = smov 64  }
  0x10   :  { %3971 = vmatpush3.msra.mxu1 %v64_v0  ;;  %3978 = vmatprep.mubr.msk.f32.mxu1 %vm72_vm0, %v4478_v2  ;;  %v61_v4 = vld [vmem:[%s5021_s1] sm:$0xff]  ;;  %v4488_v5 = vld [vmem:[#allocation2 + $0x8] sm:$0xff]  ;;  %s4384_s26 = smov 88   ;;  %s4385_s27 = smov 120   ;;  %vm1510_vm3 = vcmask 195584   ;;  %vm1507_vm4 = vcmask 130048  }
  0x11   :  { %3972 = vmatprep.subr.mxu1 %v63_v1  ;;  %3993 = vmatprep.mubr.msk.f32.mxu0 %vm4381_vm1, %v4380_v6  ;;  %v3742_v8 = vld [vmem:[%s5022_s2] ss:$0 sm:$0xff]  ;;  %s4386_s30 = smov 56   ;;  %s4387_s14 = smov 80   ;;  %vm1761_vm5 = vcmask 523264  }
  0x12   :  { %3973 = vmatpush3.msra.mxu1 %v63_v1  ;;  %s4388_s15 = smov 112   ;;  %s4389_s16 = smov 48  }
  0x13   :  { %3974 = vmatprep.subr.mxu1 %v62_v3  ;;  %s4390_s17 = smov 72   ;;  %s4391_s18 = smov 104  }
  0x14   :  { %3975 = vmatpush3.msra.mxu1 %v62_v3  ;;  %s5039_s19 = smov 40   ;;  %s5035_s20 = smov 16  }
  0x15   :  { %3976 = vmatprep.subr.mxu1 %v61_v4  ;;  %s5041_s0 = smov 24   ;;  %s5046_s28 = smov 24  }
  0x16   :  { %3977 = vmatpush3.msra.mxu1 %v61_v4 }
  0x17   :  { %3979 = vmatmul.mubr.msk.f32.vlgmr.msra.gmra.mxu1 %vm72_vm0, %v4488_v5  ;;  %3981 = vmatprep.subr.mxu1 %v4380_v6 }
  0x18   :  { %3983 = vmatprep.mubr.msk.f32.mxu1 %vm4381_vm1, %v4380_v6 }
  0xd7   :  { %v3980_v7 = vpop.f32.mrf.mxu1 }
  0xd8   :  { %v4505_v11 = vadd.f32 %v3980_v7, %v3742_v8 }
  0xd9   :  { %v145_v9 = vpop.f32.mrf.mxu1 }
  0xda   :  { %v4501_v10 = vadd.f32 %v3742_v8, %v145_v9 }
  0xdc   :  { %155 = vrot.lane.b32.xlu0 %v4501_v10, %s4382_s24 }
  0xe0   :  { %233 = vrot.lane.b32.xlu0 %v4505_v11, %s4382_s24 }
 0x14e   :  { %v156_v12 = vpop.permute.xlu0 %155 }
 0x14f   :  { %3982 = vmatpush3.xpose.msk.msra.mxu1 %vm157_vm2, %v156_v12 }
 0x150   :  { %3986 = vmatprep.subr.mxu1 %v4380_v6 }
 0x152   :  { %3984 = vmatmul.mubr.msk.f32.vlgmr.msra.gmra.mxu1 %vm157_vm2, %v4501_v10  ;;  %v234_v13 = vpop.permute.xlu0 %233 }
 0x153   :  { %3987 = vmatpush3.xpose.msk.msra.mxu1 %vm157_vm2, %v234_v13  ;;  %3988 = vmatprep.mubr.msk.f32.mxu1 %vm4381_vm1, %v4380_v6 }
 0x154   :  { %3996 = vmatprep.subr.mxu1 %v4380_v6 }
 0x156   :  { %3989 = vmatmul.mubr.msk.f32.vlgmr.msra.gmra.mxu1 %vm157_vm2, %v4505_v11 }
 0x157   :  { %3998 = vmatprep.mubr.msk.f32.mxu1 %vm4381_vm1, %v4380_v6 }
 0x212   :  { %v228_v14 = vpop.f32.mrf.mxu1 }
 0x213   :  { %v309_v15 = vmul.f32 0.35355338, %v228_v14 }
 0x214   :  { %v3985_v16 = vpop.f32.mrf.mxu1 }
 0x215   :  { %v311_v17 = vsel %vm157_vm2, %v309_v15, -inf }
 0x216   :  { %312 = vmax.xlane.f32.xlu1 %v311_v17  ;;  %v305_v18 = vpop.f32.mrf.mxu1 }
 0x217   :  { %v310_v19 = vmul.f32 0.35355338, %v305_v18 }
 0x218   :  { %v3990_v20 = vpop.f32.mrf.mxu1 }
 0x219   :  { %v314_v21 = vsel %vm157_vm2, %v310_v19, -inf }
 0x21a   :  { %315 = vmax.xlane.f32.xlu1 %v314_v21 }
 0x22b   :  { %333 = vrot.lane.b32.xlu1 %v4501_v10, %s4383_s25 }
 0x22f   :  { %409 = vrot.lane.b32.xlu1 %v4505_v11, %s4383_s25 }
 0x233   :  { %487 = vrot.lane.b32.xlu1 %v4501_v10, %s4384_s26 }
 0x237   :  { %565 = vrot.lane.b32.xlu1 %v4505_v11, %s4384_s26 }
 0x29f   :  { %v313_v22 = vpop.xlane.xlu1 %312 }
 0x2a0   :  { %v317_v23 = vsub.f32 %v309_v15, %v313_v22 }
 0x2a2   :  { %v319_v24 = vmul.f32 1.442695, %v317_v23 }
 0x2a3   :  { %v316_v25 = vpop.xlane.xlu1 %315 }
 0x2a4   :  { %4253 = vpow2.f32 %v319_v24  ;;  %v318_v26 = vsub.f32 %v310_v19, %v316_v25 }
 0x2a6   :  { %v321_v27 = vmul.f32 1.442695, %v318_v26 }
 0x2a7   :  { %v334_v28 = vpop.permute.xlu1 %333 }
 0x2a8   :  { %4255 = vpow2.f32 %v321_v27  ;;  %3992 = vmatpush3.msra.mxu0 %v334_v28 }
 0x2a9   :  { %4001 = vmatprep.subr.mxu0 %v4380_v6 }
 0x2ab   :  { %v410_v29 = vpop.permute.xlu1 %409 }
 0x2ac   :  { %3997 = vmatpush3.msra.mxu1 %v410_v29 }
 0x2ad   :  { %4006 = vmatprep.subr.mxu1 %v4380_v6 }
 0x2af   :  { %v488_v34 = vpop.permute.xlu1 %487 }
 0x2b1   :  { %v4254_v30 = vpop.eup %4253 }
 0x2b2   :  { %v323_v31 = vsel %vm157_vm2, %v4254_v30, 0.0 }
 0x2b3   :  { %324 = vadd.xlane.f32.xlu0 %v323_v31  ;;  %v566_v35 = vpop.permute.xlu1 %565 }
 0x2b5   :  { %v4256_v32 = vpop.eup %4255 }
 0x2b6   :  { %v326_v33 = vsel %vm157_vm2, %v4256_v32, 0.0 }
 0x2b7   :  { %327 = vadd.xlane.f32.xlu1 %v326_v33 }
 0x2c8   :  { %563 = vrot.lane.b32.xlu1 %v4505_v11, %s4385_s27 }
 0x2c9   :  { %485 = vrot.lane.b32.xlu0 %v4501_v10, %s4385_s27 }
 0x33c   :  { %v325_v36 = vpop.xlane.xlu0 %324 }
 0x33d   :  { %4257 = vrcp.f32 %v325_v36 }
 0x340   :  { %v328_v37 = vpop.xlane.xlu1 %327  ;;  %v486_v42 = vpop.permute.xlu0 %485 }
 0x341   :  { %4259 = vrcp.f32 %v328_v37 }
 0x344   :  { %v564_v43 = vpop.permute.xlu1 %563 }
 0x34a   :  { %v4258_v38 = vpop.eup %4257 }
 0x34b   :  { %v330_v39 = vmul.f32 %v4258_v38, %v4254_v30 }
 0x34d   :  { %3994 = vmatmul.mubr.msk.f32.vlgmr.msra.gmra.mxu0 %vm157_vm2, %v330_v39 }
 0x34e   :  { %v4260_v40 = vpop.eup %4259  ;;  %4002 = vmatpush3.xpose.msk.msra.mxu0 %vm157_vm2, %v488_v34  ;;  %4003 = vmatprep.mubr.msk.f32.mxu0 %vm4381_vm1, %v4380_v6 }
 0x34f   :  { %v332_v41 = vmul.f32 %v4260_v40, %v4256_v32  ;;  %4011 = vmatprep.subr.mxu0 %v4380_v6 }
 0x351   :  { %3999 = vmatmul.mubr.msk.f32.vlgmr.msra.gmra.mxu1 %vm157_vm2, %v332_v41  ;;  %4004 = vmatmul.mubr.msk.f32.vlgmr.msra.gmra.mxu0 %vm157_vm2, %v486_v42 }
 0x352   :  { %4007 = vmatpush3.xpose.msk.msra.mxu1 %vm157_vm2, %v566_v35  ;;  %4008 = vmatprep.mubr.msk.f32.mxu1 %vm4381_vm1, %v4380_v6 }
 0x353   :  { %4016 = vmatprep.subr.mxu1 %v4380_v6  ;;  %4013 = vmatprep.mubr.msk.f32.mxu0 %vm4381_vm1, %v4380_v6 }
 0x355   :  { %4009 = vmatmul.mubr.msk.f32.vlgmr.msra.gmra.mxu1 %vm157_vm2, %v564_v43 }
 0x356   :  { %4018 = vmatprep.mubr.msk.f32.mxu1 %vm4381_vm1, %v4380_v6 }
 0x40d   :  { %v4555_v44 = vpop.f32.mrf.mxu0 }
 0x40f   :  { %v3995_v45 = vpop.f32.mrf.mxu0 }
 0x411   :  { %v4557_v46 = vpop.f32.mrf.mxu1  ;;  %v559_v47 = vpop.f32.mrf.mxu0 }
 0x412   :  { %v641_v48 = vmul.f32 0.35355338, %v559_v47 }
 0x413   :  { %v4000_v49 = vpop.f32.mrf.mxu1  ;;  %v4005_v50 = vpop.f32.mrf.mxu0 }
 0x414   :  { %v643_v51 = vsel %vm157_vm2, %v641_v48, -inf }
 0x415   :  { %v637_v52 = vpop.f32.mrf.mxu1  ;;  %644 = vmax.xlane.f32.xlu1 %v643_v51 }
 0x416   :  { %v642_v53 = vmul.f32 0.35355338, %v637_v52 }
 0x417   :  { %v4010_v54 = vpop.f32.mrf.mxu1 }
 0x418   :  { %v646_v55 = vsel %vm157_vm2, %v642_v53, -inf }
 0x419   :  { %647 = vmax.xlane.f32.xlu0 %v646_v55 }
 0x426   :  { %665 = vrot.lane.b32.xlu1 %v4501_v10, %s4386_s30 }
 0x42a   :  { %819 = vrot.lane.b32.xlu1 %v4501_v10, %s4387_s14 }
 0x42e   :  { %897 = vrot.lane.b32.xlu1 %v4505_v11, %s4387_s14 }
 0x42f   :  { %741 = vrot.lane.b32.xlu0 %v4505_v11, %s4386_s30 }
 0x433   :  { %817 = vrot.lane.b32.xlu0 %v4501_v10, %s4388_s15 }
 0x49e   :  { %v645_v56 = vpop.xlane.xlu1 %644 }
 0x49f   :  { %v649_v57 = vsub.f32 %v641_v48, %v645_v56 }
 0x4a1   :  { %v651_v58 = vmul.f32 1.442695, %v649_v57 }
 0x4a2   :  { %v666_v59 = vpop.permute.xlu1 %665  ;;  %v648_v60 = vpop.xlane.xlu0 %647 }
 0x4a3   :  { %4261 = vpow2.f32 %v651_v58  ;;  %v650_v61 = vsub.f32 %v642_v53, %v648_v60  ;;  %4012 = vmatpush3.msra.mxu0 %v666_v59 }
 0x4a4   :  { %4021 = vmatprep.subr.mxu0 %v4380_v6 }
 0x4a5   :  { %v653_v62 = vmul.f32 1.442695, %v650_v61 }
 0x4a6   :  { %v742_v63 = vpop.permute.xlu0 %741  ;;  %v820_v7 = vpop.permute.xlu1 %819 }
 0x4a7   :  { %4263 = vpow2.f32 %v653_v62  ;;  %4017 = vmatpush3.msra.mxu1 %v742_v63 }
 0x4a8   :  { %4026 = vmatprep.subr.mxu1 %v4380_v6 }
 0x4aa   :  { %v898_v8 = vpop.permute.xlu1 %897  ;;  %v818_v17 = vpop.permute.xlu0 %817 }
 0x4b0   :  { %v4262_v0 = vpop.eup %4261 }
 0x4b1   :  { %v655_v1 = vsel %vm157_vm2, %v4262_v0, 0.0 }
 0x4b2   :  { %656 = vadd.xlane.f32.xlu1 %v655_v1 }
 0x4b4   :  { %v4264_v3 = vpop.eup %4263 }
 0x4b5   :  { %v658_v4 = vsel %vm157_vm2, %v4264_v3, 0.0 }
 0x4b6   :  { %659 = vadd.xlane.f32.xlu1 %v658_v4 }
 0x4c7   :  { %895 = vrot.lane.b32.xlu1 %v4505_v11, %s4388_s15 }
 0x53b   :  { %v657_v9 = vpop.xlane.xlu1 %656 }
 0x53c   :  { %4265 = vrcp.f32 %v657_v9 }
 0x53f   :  { %v660_v12 = vpop.xlane.xlu1 %659 }
 0x540   :  { %4267 = vrcp.f32 %v660_v12 }
 0x543   :  { %v896_v18 = vpop.permute.xlu1 %895 }
 0x549   :  { %v4266_v13 = vpop.eup %4265 }
 0x54a   :  { %v662_v14 = vmul.f32 %v4266_v13, %v4262_v0 }
 0x54c   :  { %4014 = vmatmul.mubr.msk.f32.vlgmr.msra.gmra.mxu0 %vm157_vm2, %v662_v14 }
 0x54d   :  { %v4268_v15 = vpop.eup %4267  ;;  %4022 = vmatpush3.xpose.msk.msra.mxu0 %vm157_vm2, %v820_v7  ;;  %4023 = vmatprep.mubr.msk.f32.mxu0 %vm4381_vm1, %v4380_v6 }
 0x54e   :  { %v664_v16 = vmul.f32 %v4268_v15, %v4264_v3  ;;  %4031 = vmatprep.subr.mxu0 %v4380_v6 }
 0x550   :  { %4019 = vmatmul.mubr.msk.f32.vlgmr.msra.gmra.mxu1 %vm157_vm2, %v664_v16  ;;  %4024 = vmatmul.mubr.msk.f32.vlgmr.msra.gmra.mxu0 %vm157_vm2, %v818_v17 }
 0x551   :  { %4027 = vmatpush3.xpose.msk.msra.mxu1 %vm157_vm2, %v898_v8  ;;  %4028 = vmatprep.mubr.msk.f32.mxu1 %vm4381_vm1, %v4380_v6 }
 0x552   :  { %4036 = vmatprep.subr.mxu1 %v4380_v6  ;;  %4033 = vmatprep.mubr.msk.f32.mxu0 %vm4381_vm1, %v4380_v6 }
 0x554   :  { %4029 = vmatmul.mubr.msk.f32.vlgmr.msra.gmra.mxu1 %vm157_vm2, %v896_v18 }
 0x555   :  { %4038 = vmatprep.mubr.msk.f32.mxu1 %vm4381_vm1, %v4380_v6 }
 0x60c   :  { %v4593_v19 = vpop.f32.mrf.mxu0 }
 0x60e   :  { %v4015_v20 = vpop.f32.mrf.mxu0 }
 0x610   :  { %v4595_v21 = vpop.f32.mrf.mxu1  ;;  %v891_v22 = vpop.f32.mrf.mxu0 }
 0x611   :  { %v973_v23 = vmul.f32 0.35355338, %v891_v22 }
 0x612   :  { %v4020_v24 = vpop.f32.mrf.mxu1  ;;  %v4025_v25 = vpop.f32.mrf.mxu0 }
 0x613   :  { %v975_v26 = vsel %vm157_vm2, %v973_v23, -inf  ;;  %v1515_v25 = vld [vmem:[%s5023_s3 + $0x10] sm:$0xff] }
 0x614   :  { %v969_v27 = vpop.f32.mrf.mxu1  ;;  %976 = vmax.xlane.f32.xlu0 %v975_v26  ;;  %v1514_v26 = vld [vmem:[%s5023_s3 + $0x8] sm:$0xff] }
 0x615   :  { %v974_v28 = vmul.f32 0.35355338, %v969_v27  ;;  %v1513_v27 = vld [vmem:[%s5023_s3] sm:$0xff] }
 0x616   :  { %v4030_v29 = vpop.f32.mrf.mxu1 }
 0x617   :  { %v978_v30 = vsel %vm157_vm2, %v974_v28, -inf }
 0x618   :  { %979 = vmax.xlane.f32.xlu1 %v978_v30 }
 0x629   :  { %997 = vrot.lane.b32.xlu1 %v4501_v10, %s4389_s16 }
 0x62a   :  { %1073 = vrot.lane.b32.xlu0 %v4505_v11, %s4389_s16 }
 0x62d   :  { %1151 = vrot.lane.b32.xlu1 %v4501_v10, %s4390_s17 }
 0x631   :  { %1229 = vrot.lane.b32.xlu1 %v4505_v11, %s4390_s17 }
 0x635   :  { %1227 = vrot.lane.b32.xlu1 %v4505_v11, %s4391_s18 }
 0x69d   :  { %v977_v31 = vpop.xlane.xlu0 %976 }
 0x69e   :  { %v981_v32 = vsub.f32 %v973_v23, %v977_v31 }
 0x6a0   :  { %v983_v33 = vmul.f32 1.442695, %v981_v32 }
 0x6a1   :  { %v980_v34 = vpop.xlane.xlu1 %979  ;;  %v1074_v35 = vpop.permute.xlu0 %1073 }
 0x6a2   :  { %4269 = vpow2.f32 %v983_v33  ;;  %v982_v36 = vsub.f32 %v974_v28, %v980_v34  ;;  %4037 = vmatpush3.msra.mxu1 %v1074_v35 }
 0x6a3   :  { %4046 = vmatprep.subr.mxu1 %v4380_v6 }
 0x6a4   :  { %v985_v37 = vmul.f32 1.442695, %v982_v36 }
 0x6a5   :  { %v998_v38 = vpop.permute.xlu1 %997 }
 0x6a6   :  { %4271 = vpow2.f32 %v985_v37  ;;  %4032 = vmatpush3.msra.mxu0 %v998_v38 }
 0x6a7   :  { %4041 = vmatprep.subr.mxu0 %v4380_v6 }
 0x6a9   :  { %v1152_v47 = vpop.permute.xlu1 %1151 }
 0x6ad   :  { %v1230_v51 = vpop.permute.xlu1 %1229 }
 0x6af   :  { %v4270_v39 = vpop.eup %4269 }
 0x6b0   :  { %v987_v40 = vsel %vm157_vm2, %v4270_v39, 0.0 }
 0x6b1   :  { %988 = vadd.xlane.f32.xlu0 %v987_v40  ;;  %v1228_v54 = vpop.permute.xlu1 %1227 }
 0x6b3   :  { %v4272_v41 = vpop.eup %4271 }
 0x6b4   :  { %v990_v42 = vsel %vm157_vm2, %v4272_v41, 0.0 }
 0x6b5   :  { %991 = vadd.xlane.f32.xlu0 %v990_v42 }
 0x6cb   :  { %1149 = vrot.lane.b32.xlu0 %v4501_v10, %s4391_s18 }
 0x73a   :  { %v989_v43 = vpop.xlane.xlu0 %988 }
 0x73b   :  { %4273 = vrcp.f32 %v989_v43 }
 0x73e   :  { %v992_v45 = vpop.xlane.xlu0 %991 }
 0x73f   :  { %4275 = vrcp.f32 %v992_v45 }
 0x742   :  { %v1150_v53 = vpop.permute.xlu0 %1149 }
 0x748   :  { %v4274_v48 = vpop.eup %4273 }
 0x749   :  { %v994_v49 = vmul.f32 %v4274_v48, %v4270_v39 }
 0x74b   :  { %4034 = vmatmul.mubr.msk.f32.vlgmr.msra.gmra.mxu0 %vm157_vm2, %v994_v49 }
 0x74c   :  { %v4276_v50 = vpop.eup %4275  ;;  %4042 = vmatpush3.xpose.msk.msra.mxu0 %vm157_vm2, %v1152_v47  ;;  %4043 = vmatprep.mubr.msk.f32.mxu0 %vm4381_vm1, %v4380_v6 }
 0x74d   :  { %v996_v52 = vmul.f32 %v4276_v50, %v4272_v41  ;;  %4051 = vmatprep.subr.mxu0 %v4380_v6 }
 0x74f   :  { %4039 = vmatmul.mubr.msk.f32.vlgmr.msra.gmra.mxu1 %vm157_vm2, %v996_v52  ;;  %4044 = vmatmul.mubr.msk.f32.vlgmr.msra.gmra.mxu0 %vm157_vm2, %v1150_v53 }
 0x750   :  { %4047 = vmatpush3.xpose.msk.msra.mxu1 %vm157_vm2, %v1230_v51  ;;  %4048 = vmatprep.mubr.msk.f32.mxu1 %vm4381_vm1, %v4380_v6 }
 0x751   :  { %4056 = vmatprep.subr.mxu1 %v4380_v6  ;;  %4053 = vmatprep.mubr.msk.f32.mxu0 %vm4381_vm1, %v4380_v6 }
 0x753   :  { %4049 = vmatmul.mubr.msk.f32.vlgmr.msra.gmra.mxu1 %vm157_vm2, %v1228_v54 }
 0x754   :  { %4058 = vmatprep.mubr.msk.f32.mxu1 %vm4381_vm1, %v4380_v6 }
 0x80b   :  { %v1069_v55 = vpop.f32.mrf.mxu0 }
 0x80d   :  { %v4035_v56 = vpop.f32.mrf.mxu0 }
 0x80f   :  { %v1145_v57 = vpop.f32.mrf.mxu1  ;;  %v1223_v58 = vpop.f32.mrf.mxu0 }
 0x810   :  { %v1305_v59 = vmul.f32 0.35355338, %v1223_v58 }
 0x811   :  { %v4040_v60 = vpop.f32.mrf.mxu1  ;;  %v4045_v61 = vpop.f32.mrf.mxu0 }
 0x812   :  { %v1307_v62 = vsel %vm157_vm2, %v1305_v59, -inf }
 0x813   :  { %v1301_v63 = vpop.f32.mrf.mxu1  ;;  %1308 = vmax.xlane.f32.xlu0 %v1307_v62  ;;  %v1654_v62 = vld [vmem:[%s5025_s5 + $0x10] sm:$0xff] }
 0x814   :  { %v1306_v0 = vmul.f32 0.35355338, %v1301_v63  ;;  %v1653_v63 = vld [vmem:[%s5025_s5 + $0x8] sm:$0xff] }
 0x815   :  { %v4050_v1 = vpop.f32.mrf.mxu1 }
 0x816   :  { %v1310_v3 = vsel %vm157_vm2, %v1306_v0, -inf  ;;  %v1753_v1 = vld [vmem:[%s5027_s7 + $0x38] sm:$0xff] }
 0x817   :  { %1311 = vmax.xlane.f32.xlu1 %v1310_v3  ;;  %v1752_v3 = vld [vmem:[%s5027_s7 + $0x30] sm:$0xff] }
 0x828   :  { %1329 = vrot.lane.b32.xlu1 %v4501_v10, %s5039_s19 }
 0x82c   :  { %1483 = vrot.lane.b32.xlu1 %v4593_v19, %s5037_s29 }
 0x830   :  { %1485 = vrot.lane.b32.xlu1 %v4595_v21, %s5037_s29 }
 0x834   :  { %1493 = vrot.lane.b32.xlu1 %v1145_v57, %s5035_s20 }
 0x89c   :  { %v1309_v4 = vpop.xlane.xlu0 %1308 }
 0x89d   :  { %v1313_v7 = vsub.f32 %v1305_v59, %v1309_v4  ;;  %v1751_v4 = vld [vmem:[%s5027_s7 + $0x28] sm:$0xff] }
 0x89f   :  { %v1315_v8 = vmul.f32 1.442695, %v1313_v7  ;;  %v1750_v7 = vld [vmem:[%s5027_s7 + $0x20] sm:$0xff] }
 0x8a0   :  { %v1312_v9 = vpop.xlane.xlu1 %1311 }
 0x8a1   :  { %4277 = vpow2.f32 %v1315_v8  ;;  %v1314_v12 = vsub.f32 %v1306_v0, %v1312_v9  ;;  %v1652_v0 = vld [vmem:[%s5025_s5] sm:$0xff] }
 0x8a3   :  { %v1317_v13 = vmul.f32 1.442695, %v1314_v12 }
 0x8a4   :  { %v1330_v14 = vpop.permute.xlu1 %1329 }
 0x8a5   :  { %4279 = vpow2.f32 %v1317_v13  ;;  %4052 = vmatpush3.msra.mxu0 %v1330_v14 }
 0x8a8   :  { %v1484_v32 = vpop.permute.xlu1 %1483 }
 0x8a9   :  { %v1505_v35 = vsel %vm157_vm2, %v4555_v44, %v1484_v32  ;;  %v3769_v44 = vld [vmem:[%s5024_s4] ss:$0 sm:$0xff] }
 0x8ac   :  { %v1486_v33 = vpop.permute.xlu1 %1485 }
 0x8ad   :  { %v1506_v40 = vsel %vm157_vm2, %v4557_v46, %v1486_v33 }
 0x8ae   :  { %v4278_v10 = vpop.eup %4277 }
 0x8af   :  { %v1319_v15 = vsel %vm157_vm2, %v4278_v10, 0.0 }
 0x8b0   :  { %1320 = vadd.xlane.f32.xlu0 %v1319_v15  ;;  %v1494_v36 = vpop.permute.xlu1 %1493 }
 0x8b1   :  { %v1509_v41 = vsel %vm1507_vm4, %v1506_v40, %v1494_v36 }
 0x8b2   :  { %v4280_v16 = vpop.eup %4279 }
 0x8b3   :  { %v1322_v17 = vsel %vm157_vm2, %v4280_v16, 0.0 }
 0x8b4   :  { %1323 = vadd.xlane.f32.xlu0 %v1322_v17 }
 0x8ca   :  { %1405 = vrot.lane.b32.xlu0 %v4505_v11, %s5039_s19  ;;  %v1516_v11 = vld [vmem:[%s5023_s3 + $0x18] sm:$0xff] }
 0x8cb   :  { %4061 = vmatprep.subr.mxu0 %v1516_v11 }
 0x8ce   :  { %1491 = vrot.lane.b32.xlu0 %v1069_v55, %s5035_s20 }
 0x939   :  { %v1321_v18 = vpop.xlane.xlu0 %1320 }
 0x93a   :  { %4281 = vrcp.f32 %v1321_v18  ;;  %v3773_v18 = vld [vmem:[%s5030_s10] ss:$0 sm:$0xff] }
 0x93d   :  { %v1324_v19 = vpop.xlane.xlu0 %1323 }
 0x93e   :  { %4283 = vrcp.f32 %v1324_v19 }
 0x941   :  { %v1406_v20 = vpop.permute.xlu0 %1405 }
 0x942   :  { %4057 = vmatpush3.msra.mxu1 %v1406_v20 }
 0x945   :  { %v1492_v34 = vpop.permute.xlu0 %1491 }
 0x946   :  { %v1508_v37 = vsel %vm1507_vm4, %v1505_v35, %v1492_v34  ;;  %v3777_v35 = vld [vmem:[%s5028_s8] ss:$0 sm:$0xff] }
 0x947   :  { %v4282_v21 = vpop.eup %4281 }
 0x948   :  { %v1326_v22 = vmul.f32 %v4282_v21, %v4278_v10 }
 0x94a   :  { %4054 = vmatmul.mubr.msk.f32.vlgmr.msra.gmra.mxu0 %vm157_vm2, %v1326_v22 }
 0x94b   :  { %v4284_v23 = vpop.eup %4283  ;;  %4062 = vmatpush3.msra.mxu0 %v1516_v11  ;;  %v1749_v11 = vld [vmem:[%s5027_s7 + $0x18] sm:$0xff] }
 0x94c   :  { %v1328_v24 = vmul.f32 %v4284_v23, %v4280_v16  ;;  %4063 = vmatprep.subr.mxu0 %v1515_v25  ;;  %v3772_v16 = vld [vmem:[%s5029_s9] ss:$0 sm:$0xff] }
 0x94d   :  { %4064 = vmatpush3.msra.mxu0 %v1515_v25  ;;  %v1748_v25 = vld [vmem:[%s5027_s7 + $0x10] sm:$0xff] }
 0x94e   :  { %4059 = vmatmul.mubr.msk.f32.vlgmr.msra.gmra.mxu1 %vm157_vm2, %v1328_v24  ;;  %4065 = vmatprep.subr.mxu0 %v1514_v26 }
 0x94f   :  { %4066 = vmatpush3.msra.mxu0 %v1514_v26  ;;  %v1747_v26 = vld [vmem:[%s5027_s7 + $0x8] sm:$0xff] }
 0x950   :  { %4067 = vmatprep.subr.mxu0 %v1513_v27 }
 0x951   :  { %4068 = vmatpush3.msra.mxu0 %v1513_v27  ;;  %v1746_v27 = vld [vmem:[%s5027_s7] sm:$0xff] }
 0x952   :  { %4083 = vmatprep.subr.mxu0 %v1753_v1 }
 0xa0a   :  { %v1401_v28 = vpop.f32.mrf.mxu0 }
 0xa0b   :  { %1499 = vrot.lane.b32.xlu0 %v1401_v28, %s5041_s0  ;;  %v3774_v28 = vld [vmem:[%s5026_s6] ss:$0 sm:$0xff] }
 0xa0c   :  { %v4055_v29 = vpop.f32.mrf.mxu0 }
 0xa0e   :  { %v1477_v30 = vpop.f32.mrf.mxu1 }
 0xa0f   :  { %1501 = vrot.lane.b32.xlu1 %v1477_v30, %s5041_s0 }
 0xa10   :  { %v4060_v31 = vpop.f32.mrf.mxu1 }
 0xa7d   :  { %v1500_v38 = vpop.permute.xlu0 %1499 }
 0xa7e   :  { %v1511_v39 = vsel %vm1510_vm3, %v1508_v37, %v1500_v38 }
 0xa7f   :  { %4069 = vmatprep.mubr.msk.f32.mxu0 %vm72_vm0, %v1511_v39 }
 0xa81   :  { %v1502_v42 = vpop.permute.xlu1 %1501 }
 0xa82   :  { %v1512_v43 = vsel %vm1510_vm3, %v1509_v41, %v1502_v42 }
 0xa83   :  { %4070 = vmatmul.mubr.msk.f32.vlgmr.msra.gmra.mxu0 %vm72_vm0, %v1512_v43 }
 0xa84   :  { %4084 = vmatpush3.msra.mxu0 %v1753_v1 }
 0xa85   :  { %4085 = vmatprep.subr.mxu0 %v1752_v3 }
 0xa86   :  { %4086 = vmatpush3.msra.mxu0 %v1752_v3 }
 0xa87   :  { %4087 = vmatprep.subr.mxu0 %v1751_v4 }
 0xa88   :  { %4088 = vmatpush3.msra.mxu0 %v1751_v4 }
 0xa89   :  { %4089 = vmatprep.subr.mxu0 %v1750_v7 }
 0xa8a   :  { %4090 = vmatpush3.msra.mxu0 %v1750_v7  ;;  %v3781_v7 = vld [vmem:[%s5032_s12] ss:$0 sm:$0xff] }
 0xa8b   :  { %4091 = vmatprep.subr.mxu0 %v1749_v11 }
 0xa8c   :  { %4092 = vmatpush3.msra.mxu0 %v1749_v11 }
 0xa8d   :  { %4093 = vmatprep.subr.mxu0 %v1748_v25 }
 0xa8e   :  { %4094 = vmatpush3.msra.mxu0 %v1748_v25 }
 0xa8f   :  { %4095 = vmatprep.subr.mxu0 %v1747_v26 }
 0xa90   :  { %4096 = vmatpush3.msra.mxu0 %v1747_v26 }
 0xa91   :  { %4097 = vmatprep.subr.mxu0 %v1746_v27 }
 0xa92   :  { %4098 = vmatpush3.msra.mxu0 %v1746_v27 }
 0xa93   :  { %4123 = vmatprep.subr.mxu0 %v4380_v6 }
 0xb43   :  { %v4071_v45 = vpop.f32.mrf.mxu0 }
 0xb44   :  { %v1602_v47 = vadd.f32 %v4071_v45, %v3769_v44 }
 0xb45   :  { %v1596_v48 = vpop.f32.mrf.mxu0 }
 0xb46   :  { %v1597_v49 = vadd.f32 %v3769_v44, %v1596_v48  ;;  %v1606_v50 = vadd.f32 %v1602_v47, %v4488_v5 }
 0xb48   :  { %v1612_v51 = vsel %vm72_vm0, %v1606_v50, 0.0  ;;  %v1605_v46 = vadd.f32 %v1597_v49, %v4478_v2  ;;  %v1655_v2 = vld [vmem:[%s5025_s5 + $0x18] sm:$0xff] }
 0xb49   :  { %1613 = vadd.xlane.f32.xlu1 %v1612_v51  ;;  %4072 = vmatprep.subr.mxu1 %v1655_v2 }
 0xb4a   :  { %v1609_v52 = vsel %vm72_vm0, %v1605_v46, 0.0  ;;  %4073 = vmatpush3.msra.mxu1 %v1655_v2 }
 0xb4b   :  { %1610 = vadd.xlane.f32.xlu0 %v1609_v52  ;;  %4074 = vmatprep.subr.mxu1 %v1654_v62 }
 0xb4c   :  { %4075 = vmatpush3.msra.mxu1 %v1654_v62 }
 0xb4d   :  { %4076 = vmatprep.subr.mxu1 %v1653_v63 }
 0xb4e   :  { %4077 = vmatpush3.msra.mxu1 %v1653_v63  ;;  %v3780_v63 = vld [vmem:[%s5031_s11] ss:$0 sm:$0xff] }
 0xb4f   :  { %4078 = vmatprep.subr.mxu1 %v1652_v0 }
 0xb50   :  { %4079 = vmatpush3.msra.mxu1 %v1652_v0 }
 0xbd2   :  { %v1614_v53 = vpop.xlane.xlu1 %1613 }
 0xbd3   :  { %v1617_v54 = vmul.f32 0.03125, %v1614_v53 }
 0xbd4   :  { %v1611_v55 = vpop.xlane.xlu0 %1610 }
 0xbd5   :  { %v1616_v56 = vmul.f32 0.03125, %v1611_v55  ;;  %v1619_v57 = vsub.f32 %v1606_v50, %v1617_v54  ;;  %v3785_v54 = vld [vmem:[%s5021_s1 + $0x38] sm:$0xff]  ;;  %v3784_v55 = vld [vmem:[%s5021_s1 + $0x30] sm:$0xff] }
 0xbd6   :  { %4102 = vmatprep.subr.mxu1 %v3785_v54 }
 0xbd7   :  { %v1618_v58 = vsub.f32 %v1605_v46, %v1616_v56  ;;  %v1621_v61 = vmul.f32 %v1619_v57, %v1619_v57  ;;  %v3783_v56 = vld [vmem:[%s5021_s1 + $0x28] sm:$0xff] }
 0xbd9   :  { %v1620_v59 = vmul.f32 %v1618_v58, %v1618_v58  ;;  %v1625_v5 = vsel %vm72_vm0, %v1621_v61, 0.0 }
 0xbdb   :  { %v1622_v60 = vsel %vm72_vm0, %v1620_v59, 0.0 }
 0xbdc   :  { %1623 = vadd.xlane.f32.xlu0 %v1622_v60 }
 0xbe0   :  { %1626 = vadd.xlane.f32.xlu0 %v1625_v5 }
 0xc65   :  { %v1624_v8 = vpop.xlane.xlu0 %1623 }
 0xc66   :  { %v1628_v9 = vmul.f32 0.03125, %v1624_v8 }
 0xc68   :  { %v1630_v12 = vadd.f32 1e-05, %v1628_v9 }
 0xc69   :  { %v1627_v13 = vpop.xlane.xlu0 %1626 }
 0xc6a   :  { %4285 = vrsqrt.f32 %v1630_v12  ;;  %v1629_v14 = vmul.f32 0.03125, %v1627_v13  ;;  %v3787_v13 = vld [vmem:[%s5022_s2 + $0x1] ss:$0 sm:$0xff]  ;;  %s5043_s2 = smov 40  }
 0xc6c   :  { %v1631_v10 = vadd.f32 1e-05, %v1629_v14 }
 0xc6e   :  { %4287 = vrsqrt.f32 %v1631_v10 }
 0xc77   :  { %v4286_v15 = vpop.eup %4285 }
 0xc78   :  { %v1634_v17 = vmul.f32 %v4286_v15, %v1618_v58 }
 0xc7a   :  { %v1642_v19 = vmul.f32 %v3772_v16, %v1634_v17 }
 0xc7b   :  { %v4288_v20 = vpop.eup %4287 }
 0xc7c   :  { %v1635_v21 = vmul.f32 %v4288_v20, %v1619_v57  ;;  %v1650_v22 = vadd.f32 %v3773_v18, %v1642_v19  ;;  %v3782_v57 = vld [vmem:[%s5021_s1 + $0x20] sm:$0xff] }
 0xc7e   :  { %v1643_v23 = vmul.f32 %v3772_v16, %v1635_v21  ;;  %4080 = vmatprep.mubr.msk.f32.mxu1 %vm72_vm0, %v1650_v22 }
 0xc80   :  { %v1651_v24 = vadd.f32 %v3773_v18, %v1643_v23 }
 0xc82   :  { %4081 = vmatmul.mubr.msk.f32.vlgmr.msra.gmra.mxu1 %vm72_vm0, %v1651_v24 }
 0xc83   :  { %4103 = vmatpush3.msra.mxu1 %v3785_v54 }
 0xc84   :  { %4104 = vmatprep.subr.mxu1 %v3784_v55 }
 0xc85   :  { %4105 = vmatpush3.msra.mxu1 %v3784_v55 }
 0xc86   :  { %4106 = vmatprep.subr.mxu1 %v3783_v56 }
 0xc87   :  { %4107 = vmatpush3.msra.mxu1 %v3783_v56 }
 0xc88   :  { %4108 = vmatprep.subr.mxu1 %v3782_v57 }
 0xc89   :  { %4109 = vmatpush3.msra.mxu1 %v3782_v57 }
 0xc8a   :  { %4113 = vmatprep.subr.mxu1 %v4380_v6 }
 0xd42   :  { %v4082_v29 = vpop.f32.mrf.mxu1 }
 0xd43   :  { %v1741_v30 = vadd.f32 %v4082_v29, %v3774_v28 }
 0xd44   :  { %v1735_v31 = vpop.f32.mrf.mxu1 }
 0xd45   :  { %v1736_v32 = vadd.f32 %v3774_v28, %v1735_v31  ;;  %v1745_v34 = vmax.f32 %v1741_v30, 0.0 }
 0xd47   :  { %v1744_v33 = vmax.f32 %v1736_v32, 0.0 }
 0xd49   :  { %4099 = vmatprep.mubr.msk.f32.mxu0 %vm1761_vm5, %v1744_v33 }
 0xd4a   :  { %4100 = vmatmul.mubr.msk.f32.vlgmr.msra.gmra.mxu0 %vm1761_vm5, %v1745_v34 }
 0xd4b   :  { %4125 = vmatprep.mubr.msk.f32.mxu0 %vm4381_vm1, %v4380_v6 }
 0xe0a   :  { %v4101_v36 = vpop.f32.mrf.mxu0 }
 0xe0b   :  { %v1840_v37 = vadd.f32 %v4101_v36, %v3777_v35 }
 0xe0c   :  { %v1834_v38 = vpop.f32.mrf.mxu0 }
 0xe0d   :  { %v1835_v39 = vadd.f32 %v3777_v35, %v1834_v38  ;;  %v1844_v40 = vadd.f32 %v1840_v37, %v1651_v24 }
 0xe0f   :  { %v1850_v41 = vsel %vm72_vm0, %v1844_v40, 0.0  ;;  %v1843_v42 = vadd.f32 %v1835_v39, %v1650_v22 }
 0xe10   :  { %1851 = vadd.xlane.f32.xlu0 %v1850_v41 }
 0xe11   :  { %v1847_v43 = vsel %vm72_vm0, %v1843_v42, 0.0 }
 0xe12   :  { %1848 = vadd.xlane.f32.xlu1 %v1847_v43 }
 0xe99   :  { %v1852_v44 = vpop.xlane.xlu0 %1851 }
 0xe9a   :  { %v1854_v45 = vmul.f32 0.03125, %v1852_v44 }
 0xe9b   :  { %v1849_v47 = vpop.xlane.xlu1 %1848 }
 0xe9c   :  { %v1856_v48 = vsub.f32 %v1844_v40, %v1854_v45  ;;  %v1853_v49 = vmul.f32 0.03125, %v1849_v47 }
 0xe9e   :  { %v1855_v50 = vsub.f32 %v1843_v42, %v1853_v49  ;;  %v1858_v51 = vmul.f32 %v1856_v48, %v1856_v48 }
 0xea0   :  { %v1862_v46 = vsel %vm72_vm0, %v1858_v51, 0.0  ;;  %v1857_v52 = vmul.f32 %v1855_v50, %v1855_v50 }
 0xea1   :  { %1863 = vadd.xlane.f32.xlu0 %v1862_v46 }
 0xea2   :  { %v1859_v53 = vsel %vm72_vm0, %v1857_v52, 0.0 }
 0xea3   :  { %1860 = vadd.xlane.f32.xlu1 %v1859_v53 }
 0xf2a   :  { %v1864_v58 = vpop.xlane.xlu0 %1863 }
 0xf2b   :  { %v1866_v59 = vmul.f32 0.03125, %v1864_v58 }
 0xf2c   :  { %v1861_v60 = vpop.xlane.xlu1 %1860 }
 0xf2d   :  { %v1868_v61 = vadd.f32 1e-05, %v1866_v59  ;;  %v1865_v5 = vmul.f32 0.03125, %v1861_v60 }
 0xf2f   :  { %4289 = vrsqrt.f32 %v1868_v61  ;;  %v1867_v2 = vadd.f32 1e-05, %v1865_v5 }
 0xf31   :  { %4291 = vrsqrt.f32 %v1867_v2 }
 0xf3c   :  { %v4290_v62 = vpop.eup %4289 }
 0xf3d   :  { %v1872_v0 = vmul.f32 %v4290_v62, %v1856_v48 }
 0xf3e   :  { %v4292_v1 = vpop.eup %4291 }
 0xf3f   :  { %v1871_v3 = vmul.f32 %v4292_v1, %v1855_v50  ;;  %v1880_v4 = vmul.f32 %v3780_v63, %v1872_v0 }
 0xf41   :  { %v1879_v8 = vmul.f32 %v3780_v63, %v1871_v3  ;;  %v4760_v12 = vadd.f32 %v3781_v7, %v1880_v4 }
 0xf43   :  { %v4758_v9 = vadd.f32 %v3781_v7, %v1879_v8 }
 0xf45   :  { %4110 = vmatprep.mubr.msk.f32.mxu1 %vm72_vm0, %v4758_v9 }
 0xf46   :  { %4111 = vmatmul.mubr.msk.f32.vlgmr.msra.gmra.mxu1 %vm72_vm0, %v4760_v12 }
 0xf47   :  { %4115 = vmatprep.mubr.msk.f32.mxu1 %vm4381_vm1, %v4380_v6 }
0x1006   :  { %v4112_v14 = vpop.f32.mrf.mxu1 }
0x1007   :  { %v4771_v10 = vadd.f32 %v4112_v14, %v3787_v13 }
0x1008   :  { %v1974_v15 = vpop.f32.mrf.mxu1 }
0x1009   :  { %v4773_v16 = vadd.f32 %v3787_v13, %v1974_v15  ;;  %2061 = vrot.lane.b32.xlu0 %v4771_v10, %s4382_s24 }
0x100b   :  { %1984 = vrot.lane.b32.xlu1 %v4773_v16, %s4382_s24  ;;  %s5044_s24 = smov 8  }
0x107b   :  { %v2062_v18 = vpop.permute.xlu0 %2061 }
0x107d   :  { %v1985_v17 = vpop.permute.xlu1 %1984 }
0x107e   :  { %4114 = vmatpush3.xpose.msk.msra.mxu1 %vm157_vm2, %v1985_v17 }
0x107f   :  { %4118 = vmatprep.subr.mxu1 %v4380_v6 }
0x1081   :  { %4116 = vmatmul.mubr.msk.f32.vlgmr.msra.gmra.mxu1 %vm157_vm2, %v4773_v16 }
0x1082   :  { %4119 = vmatpush3.xpose.msk.msra.mxu1 %vm157_vm2, %v2062_v18  ;;  %4120 = vmatprep.mubr.msk.f32.mxu1 %vm4381_vm1, %v4380_v6 }
0x1083   :  { %4128 = vmatprep.subr.mxu1 %v4380_v6 }
0x1085   :  { %4121 = vmatmul.mubr.msk.f32.vlgmr.msra.gmra.mxu1 %vm157_vm2, %v4771_v10 }
0x1086   :  { %4130 = vmatprep.mubr.msk.f32.mxu1 %vm4381_vm1, %v4380_v6 }
0x1141   :  { %v2056_v19 = vpop.f32.mrf.mxu1 }
0x1142   :  { %v2137_v20 = vmul.f32 0.35355338, %v2056_v19 }
0x1143   :  { %v4117_v21 = vpop.f32.mrf.mxu1 }
0x1144   :  { %v2139_v22 = vsel %vm157_vm2, %v2137_v20, -inf }
0x1145   :  { %2140 = vmax.xlane.f32.xlu1 %v2139_v22  ;;  %v2133_v23 = vpop.f32.mrf.mxu1 }
0x1146   :  { %v2138_v24 = vmul.f32 0.35355338, %v2133_v23 }
0x1147   :  { %v4122_v11 = vpop.f32.mrf.mxu1 }
0x1148   :  { %v2142_v25 = vsel %vm157_vm2, %v2138_v24, -inf }
0x1149   :  { %2143 = vmax.xlane.f32.xlu0 %v2142_v25 }
0x1156   :  { %2161 = vrot.lane.b32.xlu1 %v4773_v16, %s4383_s25 }
0x115a   :  { %2315 = vrot.lane.b32.xlu1 %v4773_v16, %s4384_s26 }
0x115e   :  { %2393 = vrot.lane.b32.xlu1 %v4771_v10, %s4384_s26 }
0x115f   :  { %2237 = vrot.lane.b32.xlu0 %v4771_v10, %s4383_s25  ;;  %s5045_s25 = smov 16  }
0x11ce   :  { %v2141_v26 = vpop.xlane.xlu1 %2140 }
0x11cf   :  { %v2145_v27 = vsub.f32 %v2137_v20, %v2141_v26 }
0x11d1   :  { %v2147_v28 = vmul.f32 1.442695, %v2145_v27 }
0x11d2   :  { %v2162_v29 = vpop.permute.xlu1 %2161  ;;  %v2144_v30 = vpop.xlane.xlu0 %2143 }
0x11d3   :  { %4293 = vpow2.f32 %v2147_v28  ;;  %v2146_v31 = vsub.f32 %v2138_v24, %v2144_v30  ;;  %4124 = vmatpush3.msra.mxu0 %v2162_v29 }
0x11d4   :  { %4133 = vmatprep.subr.mxu0 %v4380_v6 }
0x11d5   :  { %v2149_v32 = vmul.f32 1.442695, %v2146_v31 }
0x11d6   :  { %v2238_v33 = vpop.permute.xlu0 %2237  ;;  %v2316_v38 = vpop.permute.xlu1 %2315 }
0x11d7   :  { %4295 = vpow2.f32 %v2149_v32  ;;  %4129 = vmatpush3.msra.mxu1 %v2238_v33 }
0x11d8   :  { %4138 = vmatprep.subr.mxu1 %v4380_v6 }
0x11da   :  { %v2394_v39 = vpop.permute.xlu1 %2393 }
0x11e0   :  { %v4294_v34 = vpop.eup %4293 }
0x11e1   :  { %v2151_v35 = vsel %vm157_vm2, %v4294_v34, 0.0 }
0x11e2   :  { %2152 = vadd.xlane.f32.xlu1 %v2151_v35 }
0x11e4   :  { %v4296_v36 = vpop.eup %4295 }
0x11e5   :  { %v2154_v37 = vsel %vm157_vm2, %v4296_v36, 0.0 }
0x11e6   :  { %2155 = vadd.xlane.f32.xlu0 %v2154_v37 }
0x11f3   :  { %2391 = vrot.lane.b32.xlu1 %v4771_v10, %s4385_s27 }
0x11fc   :  { %2313 = vrot.lane.b32.xlu0 %v4773_v16, %s4385_s27 }
0x126b   :  { %v2153_v40 = vpop.xlane.xlu1 %2152 }
0x126c   :  { %4297 = vrcp.f32 %v2153_v40 }
0x126f   :  { %v2156_v41 = vpop.xlane.xlu0 %2155  ;;  %v2392_v48 = vpop.permute.xlu1 %2391 }
0x1270   :  { %4299 = vrcp.f32 %v2156_v41 }
0x1273   :  { %v2314_v47 = vpop.permute.xlu0 %2313 }
0x1279   :  { %v4298_v42 = vpop.eup %4297 }
0x127a   :  { %v2158_v43 = vmul.f32 %v4298_v42, %v4294_v34 }
0x127c   :  { %4126 = vmatmul.mubr.msk.f32.vlgmr.msra.gmra.mxu0 %vm157_vm2, %v2158_v43 }
0x127d   :  { %v4300_v44 = vpop.eup %4299  ;;  %4134 = vmatpush3.xpose.msk.msra.mxu0 %vm157_vm2, %v2316_v38  ;;  %4135 = vmatprep.mubr.msk.f32.mxu0 %vm4381_vm1, %v4380_v6 }
0x127e   :  { %v2160_v45 = vmul.f32 %v4300_v44, %v4296_v36  ;;  %4143 = vmatprep.subr.mxu0 %v4380_v6 }
0x1280   :  { %4131 = vmatmul.mubr.msk.f32.vlgmr.msra.gmra.mxu1 %vm157_vm2, %v2160_v45  ;;  %4136 = vmatmul.mubr.msk.f32.vlgmr.msra.gmra.mxu0 %vm157_vm2, %v2314_v47 }
0x1281   :  { %4139 = vmatpush3.xpose.msk.msra.mxu1 %vm157_vm2, %v2394_v39  ;;  %4140 = vmatprep.mubr.msk.f32.mxu1 %vm4381_vm1, %v4380_v6 }
0x1282   :  { %4148 = vmatprep.subr.mxu1 %v4380_v6  ;;  %4145 = vmatprep.mubr.msk.f32.mxu0 %vm4381_vm1, %v4380_v6 }
0x1284   :  { %4141 = vmatmul.mubr.msk.f32.vlgmr.msra.gmra.mxu1 %vm157_vm2, %v2392_v48 }
0x1285   :  { %4150 = vmatprep.mubr.msk.f32.mxu1 %vm4381_vm1, %v4380_v6 }
0x133c   :  { %v4825_v49 = vpop.f32.mrf.mxu0 }
0x133e   :  { %v4127_v50 = vpop.f32.mrf.mxu0 }
0x1340   :  { %v4827_v51 = vpop.f32.mrf.mxu1  ;;  %v2387_v46 = vpop.f32.mrf.mxu0 }
0x1341   :  { %v2469_v52 = vmul.f32 0.35355338, %v2387_v46 }
0x1342   :  { %v4132_v53 = vpop.f32.mrf.mxu1  ;;  %v4137_v54 = vpop.f32.mrf.mxu0 }
0x1343   :  { %v2471_v55 = vsel %vm157_vm2, %v2469_v52, -inf }
0x1344   :  { %2472 = vmax.xlane.f32.xlu0 %v2471_v55  ;;  %v2465_v56 = vpop.f32.mrf.mxu1 }
0x1345   :  { %v2470_v57 = vmul.f32 0.35355338, %v2465_v56 }
0x1346   :  { %v4142_v58 = vpop.f32.mrf.mxu1 }
0x1347   :  { %v2474_v59 = vsel %vm157_vm2, %v2470_v57, -inf }
0x1348   :  { %2475 = vmax.xlane.f32.xlu1 %v2474_v59 }
0x1359   :  { %2493 = vrot.lane.b32.xlu1 %v4773_v16, %s4386_s30 }
0x135a   :  { %2569 = vrot.lane.b32.xlu0 %v4771_v10, %s4386_s30 }
0x135d   :  { %2647 = vrot.lane.b32.xlu1 %v4773_v16, %s4387_s14 }
0x1361   :  { %2725 = vrot.lane.b32.xlu1 %v4771_v10, %s4387_s14 }
0x1365   :  { %2723 = vrot.lane.b32.xlu1 %v4771_v10, %s4388_s15 }
0x13cd   :  { %v2473_v60 = vpop.xlane.xlu0 %2472 }
0x13ce   :  { %v2477_v61 = vsub.f32 %v2469_v52, %v2473_v60 }
0x13d0   :  { %v2479_v5 = vmul.f32 1.442695, %v2477_v61 }
0x13d1   :  { %v2570_v2 = vpop.permute.xlu0 %2569  ;;  %v2476_v62 = vpop.xlane.xlu1 %2475 }
0x13d2   :  { %4301 = vpow2.f32 %v2479_v5  ;;  %v2478_v63 = vsub.f32 %v2470_v57, %v2476_v62  ;;  %4149 = vmatpush3.msra.mxu1 %v2570_v2 }
0x13d3   :  { %4158 = vmatprep.subr.mxu1 %v4380_v6 }
0x13d4   :  { %v2481_v0 = vmul.f32 1.442695, %v2478_v63 }
0x13d5   :  { %v2494_v1 = vpop.permute.xlu1 %2493 }
0x13d6   :  { %4303 = vpow2.f32 %v2481_v0  ;;  %4144 = vmatpush3.msra.mxu0 %v2494_v1 }
0x13d7   :  { %4153 = vmatprep.subr.mxu0 %v4380_v6 }
0x13d9   :  { %v2648_v15 = vpop.permute.xlu1 %2647 }
0x13dd   :  { %v2726_v20 = vpop.permute.xlu1 %2725 }
0x13df   :  { %v4302_v3 = vpop.eup %4301 }
0x13e0   :  { %v2483_v4 = vsel %vm157_vm2, %v4302_v3, 0.0 }
0x13e1   :  { %2484 = vadd.xlane.f32.xlu0 %v2483_v4  ;;  %v2724_v23 = vpop.permute.xlu1 %2723 }
0x13e3   :  { %v4304_v7 = vpop.eup %4303 }
0x13e4   :  { %v2486_v8 = vsel %vm157_vm2, %v4304_v7, 0.0 }
0x13e5   :  { %2487 = vadd.xlane.f32.xlu0 %v2486_v8 }
0x13fb   :  { %2645 = vrot.lane.b32.xlu0 %v4773_v16, %s4388_s15 }
0x146a   :  { %v2485_v13 = vpop.xlane.xlu0 %2484 }
0x146b   :  { %4305 = vrcp.f32 %v2485_v13 }
0x146e   :  { %v2488_v14 = vpop.xlane.xlu0 %2487 }
0x146f   :  { %4307 = vrcp.f32 %v2488_v14 }
0x1472   :  { %v2646_v22 = vpop.permute.xlu0 %2645 }
0x1478   :  { %v4306_v17 = vpop.eup %4305 }
0x1479   :  { %v2490_v18 = vmul.f32 %v4306_v17, %v4302_v3 }
0x147b   :  { %4146 = vmatmul.mubr.msk.f32.vlgmr.msra.gmra.mxu0 %vm157_vm2, %v2490_v18 }
0x147c   :  { %v4308_v19 = vpop.eup %4307  ;;  %4154 = vmatpush3.xpose.msk.msra.mxu0 %vm157_vm2, %v2648_v15  ;;  %4155 = vmatprep.mubr.msk.f32.mxu0 %vm4381_vm1, %v4380_v6 }
0x147d   :  { %v2492_v21 = vmul.f32 %v4308_v19, %v4304_v7  ;;  %4163 = vmatprep.subr.mxu0 %v4380_v6 }
0x147f   :  { %4151 = vmatmul.mubr.msk.f32.vlgmr.msra.gmra.mxu1 %vm157_vm2, %v2492_v21  ;;  %4156 = vmatmul.mubr.msk.f32.vlgmr.msra.gmra.mxu0 %vm157_vm2, %v2646_v22 }
0x1480   :  { %4159 = vmatpush3.xpose.msk.msra.mxu1 %vm157_vm2, %v2726_v20  ;;  %4160 = vmatprep.mubr.msk.f32.mxu1 %vm4381_vm1, %v4380_v6 }
0x1481   :  { %4168 = vmatprep.subr.mxu1 %v4380_v6  ;;  %4165 = vmatprep.mubr.msk.f32.mxu0 %vm4381_vm1, %v4380_v6 }
0x1483   :  { %4161 = vmatmul.mubr.msk.f32.vlgmr.msra.gmra.mxu1 %vm157_vm2, %v2724_v23 }
0x1484   :  { %4170 = vmatprep.mubr.msk.f32.mxu1 %vm4381_vm1, %v4380_v6 }
0x153b   :  { %v4863_v24 = vpop.f32.mrf.mxu0 }
0x153d   :  { %v4147_v11 = vpop.f32.mrf.mxu0 }
0x153f   :  { %v4865_v25 = vpop.f32.mrf.mxu1  ;;  %v2719_v26 = vpop.f32.mrf.mxu0 }
0x1540   :  { %v2801_v27 = vmul.f32 0.35355338, %v2719_v26 }
0x1541   :  { %v4152_v28 = vpop.f32.mrf.mxu1  ;;  %v4157_v29 = vpop.f32.mrf.mxu0 }
0x1542   :  { %v2803_v30 = vsel %vm157_vm2, %v2801_v27, -inf  ;;  %v3816_v28 = vld [vmem:[%s5023_s3 + $0x30] sm:$0xff]  ;;  %v3815_v29 = vld [vmem:[%s5023_s3 + $0x28] sm:$0xff] }
0x1543   :  { %2804 = vmax.xlane.f32.xlu0 %v2803_v30  ;;  %v2797_v31 = vpop.f32.mrf.mxu1  ;;  %v3814_v30 = vld [vmem:[%s5023_s3 + $0x20] sm:$0xff] }
0x1544   :  { %v2802_v32 = vmul.f32 0.35355338, %v2797_v31 }
0x1545   :  { %v4162_v33 = vpop.f32.mrf.mxu1 }
0x1546   :  { %v2806_v34 = vsel %vm157_vm2, %v2802_v32, -inf }
0x1547   :  { %2807 = vmax.xlane.f32.xlu1 %v2806_v34 }
0x1558   :  { %2825 = vrot.lane.b32.xlu1 %v4773_v16, %s4389_s16 }
0x1559   :  { %2901 = vrot.lane.b32.xlu0 %v4771_v10, %s4389_s16 }
0x155c   :  { %2979 = vrot.lane.b32.xlu1 %v4773_v16, %s4390_s17 }
0x1560   :  { %3057 = vrot.lane.b32.xlu1 %v4771_v10, %s4390_s17 }
0x1564   :  { %3055 = vrot.lane.b32.xlu1 %v4771_v10, %s4391_s18 }
0x15cc   :  { %v2805_v35 = vpop.xlane.xlu0 %2804 }
0x15cd   :  { %v2809_v36 = vsub.f32 %v2801_v27, %v2805_v35 }
0x15cf   :  { %v2811_v37 = vmul.f32 1.442695, %v2809_v36 }
0x15d0   :  { %v2902_v38 = vpop.permute.xlu0 %2901  ;;  %v2808_v39 = vpop.xlane.xlu1 %2807 }
0x15d1   :  { %4309 = vpow2.f32 %v2811_v37  ;;  %v2810_v40 = vsub.f32 %v2802_v32, %v2808_v39  ;;  %4169 = vmatpush3.msra.mxu1 %v2902_v38 }
0x15d2   :  { %4178 = vmatprep.subr.mxu1 %v4380_v6 }
0x15d3   :  { %v2813_v41 = vmul.f32 1.442695, %v2810_v40 }
0x15d4   :  { %v2826_v42 = vpop.permute.xlu1 %2825 }
0x15d5   :  { %4311 = vpow2.f32 %v2813_v41  ;;  %4164 = vmatpush3.msra.mxu0 %v2826_v42 }
0x15d6   :  { %4173 = vmatprep.subr.mxu0 %v4380_v6 }
0x15d8   :  { %v2980_v46 = vpop.permute.xlu1 %2979 }
0x15dc   :  { %v3058_v55 = vpop.permute.xlu1 %3057 }
0x15de   :  { %v4310_v43 = vpop.eup %4309 }
0x15df   :  { %v2815_v44 = vsel %vm157_vm2, %v4310_v43, 0.0 }
0x15e0   :  { %2816 = vadd.xlane.f32.xlu0 %v2815_v44  ;;  %v3056_v58 = vpop.permute.xlu1 %3055 }
0x15e2   :  { %v4312_v45 = vpop.eup %4311 }
0x15e3   :  { %v2818_v47 = vsel %vm157_vm2, %v4312_v45, 0.0 }
0x15e4   :  { %2819 = vadd.xlane.f32.xlu0 %v2818_v47 }
0x15fa   :  { %2977 = vrot.lane.b32.xlu0 %v4773_v16, %s4391_s18 }
0x1669   :  { %v2817_v48 = vpop.xlane.xlu0 %2816 }
0x166a   :  { %4313 = vrcp.f32 %v2817_v48 }
0x166d   :  { %v2820_v50 = vpop.xlane.xlu0 %2819 }
0x166e   :  { %4315 = vrcp.f32 %v2820_v50 }
0x1671   :  { %v2978_v57 = vpop.permute.xlu0 %2977 }
0x1677   :  { %v4314_v52 = vpop.eup %4313 }
0x1678   :  { %v2822_v53 = vmul.f32 %v4314_v52, %v4310_v43 }
0x167a   :  { %4166 = vmatmul.mubr.msk.f32.vlgmr.msra.gmra.mxu0 %vm157_vm2, %v2822_v53 }
0x167b   :  { %v4316_v54 = vpop.eup %4315  ;;  %4174 = vmatpush3.xpose.msk.msra.mxu0 %vm157_vm2, %v2980_v46  ;;  %4175 = vmatprep.mubr.msk.f32.mxu0 %vm4381_vm1, %v4380_v6 }
0x167c   :  { %v2824_v56 = vmul.f32 %v4316_v54, %v4312_v45  ;;  %4183 = vmatprep.subr.mxu0 %v4380_v6 }
0x167e   :  { %4171 = vmatmul.mubr.msk.f32.vlgmr.msra.gmra.mxu1 %vm157_vm2, %v2824_v56  ;;  %4176 = vmatmul.mubr.msk.f32.vlgmr.msra.gmra.mxu0 %vm157_vm2, %v2978_v57 }
0x167f   :  { %4179 = vmatpush3.xpose.msk.msra.mxu1 %vm157_vm2, %v3058_v55  ;;  %4180 = vmatprep.mubr.msk.f32.mxu1 %vm4381_vm1, %v4380_v6 }
0x1680   :  { %4188 = vmatprep.subr.mxu1 %v4380_v6  ;;  %4185 = vmatprep.mubr.msk.f32.mxu0 %vm4381_vm1, %v4380_v6 }
0x1682   :  { %4181 = vmatmul.mubr.msk.f32.vlgmr.msra.gmra.mxu1 %vm157_vm2, %v3056_v58 }
0x1683   :  { %4190 = vmatprep.mubr.msk.f32.mxu1 %vm4381_vm1, %v4380_v6 }
0x173a   :  { %v2897_v59 = vpop.f32.mrf.mxu0 }
0x173c   :  { %v4167_v60 = vpop.f32.mrf.mxu0 }
0x173e   :  { %v2973_v61 = vpop.f32.mrf.mxu1  ;;  %v3051_v5 = vpop.f32.mrf.mxu0 }
0x173f   :  { %v3133_v2 = vmul.f32 0.35355338, %v3051_v5 }
0x1740   :  { %v4172_v62 = vpop.f32.mrf.mxu1  ;;  %v4177_v63 = vpop.f32.mrf.mxu0 }
0x1741   :  { %v3135_v0 = vsel %vm157_vm2, %v3133_v2, -inf  ;;  %v3828_v63 = vld [vmem:[%s5025_s5 + $0x30] sm:$0xff] }
0x1742   :  { %3136 = vmax.xlane.f32.xlu0 %v3135_v0  ;;  %v3129_v1 = vpop.f32.mrf.mxu1  ;;  %v3827_v0 = vld [vmem:[%s5025_s5 + $0x28] sm:$0xff] }
0x1743   :  { %v3134_v3 = vmul.f32 0.35355338, %v3129_v1  ;;  %v3826_v1 = vld [vmem:[%s5025_s5 + $0x20] sm:$0xff] }
0x1744   :  { %v4182_v4 = vpop.f32.mrf.mxu1 }
0x1745   :  { %v3138_v7 = vsel %vm157_vm2, %v3134_v3, -inf  ;;  %v3840_v4 = vld [vmem:[%s5027_s7 + $0x70] sm:$0xff] }
0x1746   :  { %3139 = vmax.xlane.f32.xlu1 %v3138_v7  ;;  %v3839_v7 = vld [vmem:[%s5027_s7 + $0x68] sm:$0xff] }
0x1757   :  { %3157 = vrot.lane.b32.xlu1 %v4773_v16, %s5043_s2 }
0x175b   :  { %3311 = vrot.lane.b32.xlu1 %v4863_v24, %s5044_s24 }
0x175f   :  { %3313 = vrot.lane.b32.xlu1 %v4865_v25, %s5044_s24 }
0x1763   :  { %3321 = vrot.lane.b32.xlu1 %v2973_v61, %s5045_s25 }
0x17cb   :  { %v3137_v6 = vpop.xlane.xlu0 %3136 }
0x17cc   :  { %v3141_v8 = vsub.f32 %v3133_v2, %v3137_v6  ;;  %v3838_v6 = vld [vmem:[%s5027_s7 + $0x60] sm:$0xff] }
0x17ce   :  { %v3143_v13 = vmul.f32 1.442695, %v3141_v8 }
0x17cf   :  { %v3140_v14 = vpop.xlane.xlu1 %3139 }
0x17d0   :  { %4317 = vpow2.f32 %v3143_v13  ;;  %v3142_v15 = vsub.f32 %v3134_v3, %v3140_v14  ;;  %v3841_v3 = vld [vmem:[%s5027_s7 + $0x78] sm:$0xff] }
0x17d2   :  { %v3145_v17 = vmul.f32 1.442695, %v3142_v15 }
0x17d3   :  { %v3158_v18 = vpop.permute.xlu1 %3157 }
0x17d4   :  { %4319 = vpow2.f32 %v3145_v17  ;;  %4184 = vmatpush3.msra.mxu0 %v3158_v18 }
0x17d7   :  { %v3312_v35 = vpop.permute.xlu1 %3311 }
0x17d8   :  { %v3333_v38 = vsel %vm157_vm2, %v4825_v49, %v3312_v35  ;;  %v3819_v49 = vld [vmem:[%s5024_s4 + $0x1] ss:$0 sm:$0xff] }
0x17db   :  { %v3314_v36 = vpop.permute.xlu1 %3313 }
0x17dc   :  { %v3334_v43 = vsel %vm157_vm2, %v4827_v51, %v3314_v36 }
0x17dd   :  { %v4318_v19 = vpop.eup %4317 }
0x17de   :  { %v3147_v16 = vsel %vm157_vm2, %v4318_v19, 0.0 }
0x17df   :  { %3148 = vadd.xlane.f32.xlu0 %v3147_v16  ;;  %v3322_v39 = vpop.permute.xlu1 %3321  ;;  %v3824_v16 = vld [vmem:[%s5029_s9 + $0x1] ss:$0 sm:$0xff] }
0x17e0   :  { %v3336_v44 = vsel %vm1507_vm4, %v3334_v43, %v3322_v39 }
0x17e1   :  { %v4320_v20 = vpop.eup %4319 }
0x17e2   :  { %v3150_v21 = vsel %vm157_vm2, %v4320_v20, 0.0 }
0x17e3   :  { %3151 = vadd.xlane.f32.xlu0 %v3150_v21  ;;  %v3825_v21 = vld [vmem:[%s5030_s10 + $0x1] ss:$0 sm:$0xff] }
0x17f9   :  { %3233 = vrot.lane.b32.xlu0 %v4771_v10, %s5043_s2  ;;  %v3817_v10 = vld [vmem:[%s5023_s3 + $0x38] sm:$0xff] }
0x17fa   :  { %4193 = vmatprep.subr.mxu0 %v3817_v10 }
0x17fd   :  { %3319 = vrot.lane.b32.xlu0 %v2897_v59, %s5045_s25  ;;  %s4395_s25 = smov [#allocation5]  }
0x17fe   :  { %s3730_s26 = sshll.u32 %s4395_s25, 4  ;;  %s3731_s26 = int_to_ptr.vmem [resolvable:$true] %s3730_s26 }
0x17ff   :  { %s4353_s27 = scalar_lea.vmem %s3731_s26, 256  ;;  %p4358_p6 = scmp.lt.s32.totalorder %s3731_s26, %s3731_s26 }
0x1800   :  { %p4354_p5 = scmp.ne.s32.totalorder %s3731_s26, %s4353_s27  ;;  %p4359_p7 = scmp.lt.s32.totalorder %s4353_s27, %s4353_s27 }
0x1802   :  { %p4360_p8 = por %p4359_p7, %p4358_p6 }
0x1804   :  { %p4361_p9 = pnand %p4360_p8, %p4354_p5 }
0x1868   :  { %v3149_v22 = vpop.xlane.xlu0 %3148 }
0x1869   :  { %4321 = vrcp.f32 %v3149_v22 }
0x186c   :  { %v3152_v23 = vpop.xlane.xlu0 %3151 }
0x186d   :  { %4323 = vrcp.f32 %v3152_v23 }
0x1870   :  { %v3234_v24 = vpop.permute.xlu0 %3233 }
0x1871   :  { %4189 = vmatpush3.msra.mxu1 %v3234_v24 }
0x1874   :  { %v3320_v37 = vpop.permute.xlu0 %3319 }
0x1875   :  { %v3335_v40 = vsel %vm1507_vm4, %v3333_v38, %v3320_v37  ;;  %v3843_v37 = vld [vmem:[%s5028_s8 + $0x1] ss:$0 sm:$0xff] }
0x1876   :  { %v4322_v11 = vpop.eup %4321 }
0x1877   :  { %v3154_v25 = vmul.f32 %v4322_v11, %v4318_v19 }
0x1879   :  { %4186 = vmatmul.mubr.msk.f32.vlgmr.msra.gmra.mxu0 %vm157_vm2, %v3154_v25 }
0x187a   :  { %v4324_v26 = vpop.eup %4323  ;;  %4194 = vmatpush3.msra.mxu0 %v3817_v10  ;;  %v3836_v10 = vld [vmem:[%s5027_s7 + $0x50] sm:$0xff] }
0x187b   :  { %v3156_v27 = vmul.f32 %v4324_v26, %v4320_v20  ;;  %4195 = vmatprep.subr.mxu0 %v3816_v28 }
0x187c   :  { %4196 = vmatpush3.msra.mxu0 %v3816_v28  ;;  %v3835_v28 = vld [vmem:[%s5027_s7 + $0x48] sm:$0xff] }
0x187d   :  { %4191 = vmatmul.mubr.msk.f32.vlgmr.msra.gmra.mxu1 %vm157_vm2, %v3156_v27  ;;  %4197 = vmatprep.subr.mxu0 %v3815_v29  ;;  %v3837_v27 = vld [vmem:[%s5027_s7 + $0x58] sm:$0xff] }
0x187e   :  { %4198 = vmatpush3.msra.mxu0 %v3815_v29  ;;  %v3834_v29 = vld [vmem:[%s5027_s7 + $0x40] sm:$0xff] }
0x187f   :  { %4199 = vmatprep.subr.mxu0 %v3814_v30 }
0x1880   :  { %4200 = vmatpush3.msra.mxu0 %v3814_v30  ;;  %v3831_v30 = vld [vmem:[%s5026_s6 + $0x1] ss:$0 sm:$0xff] }
0x1881   :  { %4215 = vmatprep.subr.mxu0 %v3841_v3 }
0x1939   :  { %v3229_v31 = vpop.f32.mrf.mxu0 }
0x193a   :  { %3327 = vrot.lane.b32.xlu0 %v3229_v31, %s5046_s28 }
0x193b   :  { %v4187_v32 = vpop.f32.mrf.mxu0 }
0x193d   :  { %v3305_v33 = vpop.f32.mrf.mxu1 }
0x193e   :  { %3329 = vrot.lane.b32.xlu1 %v3305_v33, %s5046_s28 }
0x193f   :  { %v4192_v34 = vpop.f32.mrf.mxu1 }
0x19ac   :  { %v3328_v41 = vpop.permute.xlu0 %3327 }
0x19ad   :  { %v3337_v42 = vsel %vm1510_vm3, %v3335_v40, %v3328_v41 }
0x19ae   :  { %4201 = vmatprep.mubr.msk.f32.mxu0 %vm72_vm0, %v3337_v42 }
0x19b0   :  { %v3330_v45 = vpop.permute.xlu1 %3329 }
0x19b1   :  { %v3338_v47 = vsel %vm1510_vm3, %v3336_v44, %v3330_v45 }
0x19b2   :  { %4202 = vmatmul.mubr.msk.f32.vlgmr.msra.gmra.mxu0 %vm72_vm0, %v3338_v47 }
0x19b3   :  { %4216 = vmatpush3.msra.mxu0 %v3841_v3 }
0x19b4   :  { %4217 = vmatprep.subr.mxu0 %v3840_v4 }
0x19b5   :  { %4218 = vmatpush3.msra.mxu0 %v3840_v4 }
0x19b6   :  { %4219 = vmatprep.subr.mxu0 %v3839_v7 }
0x19b7   :  { %4220 = vmatpush3.msra.mxu0 %v3839_v7 }
0x19b8   :  { %4221 = vmatprep.subr.mxu0 %v3838_v6 }
0x19b9   :  { %4222 = vmatpush3.msra.mxu0 %v3838_v6 }
0x19ba   :  { %4223 = vmatprep.subr.mxu0 %v3837_v27 }
0x19bb   :  { %4224 = vmatpush3.msra.mxu0 %v3837_v27 }
0x19bc   :  { %4225 = vmatprep.subr.mxu0 %v3836_v10 }
0x19bd   :  { %4226 = vmatpush3.msra.mxu0 %v3836_v10 }
0x19be   :  { %4227 = vmatprep.subr.mxu0 %v3835_v28 }
0x19bf   :  { %4228 = vmatpush3.msra.mxu0 %v3835_v28 }
0x19c0   :  { %4229 = vmatprep.subr.mxu0 %v3834_v29 }
0x19c1   :  { %4230 = vmatpush3.msra.mxu0 %v3834_v29 }
0x1a72   :  { %v4203_v48 = vpop.f32.mrf.mxu0 }
0x1a73   :  { %v3430_v50 = vadd.f32 %v4203_v48, %v3819_v49 }
0x1a74   :  { %v3424_v46 = vpop.f32.mrf.mxu0 }
0x1a75   :  { %v3434_v52 = vadd.f32 %v3430_v50, %v4760_v12  ;;  %v3425_v53 = vadd.f32 %v3819_v49, %v3424_v46 }
0x1a77   :  { %v3442_v54 = vsel %vm72_vm0, %v3434_v52, 0.0  ;;  %v3433_v51 = vadd.f32 %v3425_v53, %v4758_v9  ;;  %v3829_v9 = vld [vmem:[%s5025_s5 + $0x38] sm:$0xff] }
0x1a78   :  { %3443 = vadd.xlane.f32.xlu1 %v3442_v54  ;;  %4204 = vmatprep.subr.mxu1 %v3829_v9 }
0x1a79   :  { %v3439_v55 = vsel %vm72_vm0, %v3433_v51, 0.0  ;;  %4205 = vmatpush3.msra.mxu1 %v3829_v9  ;;  %v3849_v9 = vld [vmem:[%s5032_s12 + $0x1] ss:$0 sm:$0xff] }
0x1a7a   :  { %3440 = vadd.xlane.f32.xlu0 %v3439_v55  ;;  %4206 = vmatprep.subr.mxu1 %v3828_v63 }
0x1a7b   :  { %4207 = vmatpush3.msra.mxu1 %v3828_v63 }
0x1a7c   :  { %4208 = vmatprep.subr.mxu1 %v3827_v0 }
0x1a7d   :  { %4209 = vmatpush3.msra.mxu1 %v3827_v0 }
0x1a7e   :  { %4210 = vmatprep.subr.mxu1 %v3826_v1 }
0x1a7f   :  { %4211 = vmatpush3.msra.mxu1 %v3826_v1 }
0x1b01   :  { %v3444_v56 = vpop.xlane.xlu1 %3443 }
0x1b02   :  { %v3446_v57 = vmul.f32 0.03125, %v3444_v56 }
0x1b03   :  { %v3441_v58 = vpop.xlane.xlu0 %3440 }
0x1b04   :  { %v3445_v59 = vmul.f32 0.03125, %v3441_v58  ;;  %v3448_v60 = vsub.f32 %v3434_v52, %v3446_v57 }
0x1b06   :  { %v3447_v61 = vsub.f32 %v3433_v51, %v3445_v59  ;;  %v3450_v62 = vmul.f32 %v3448_v60, %v3448_v60 }
0x1b08   :  { %v3449_v5 = vmul.f32 %v3447_v61, %v3447_v61  ;;  %v3454_v12 = vsel %vm72_vm0, %v3450_v62, 0.0 }
0x1b0a   :  { %v3451_v2 = vsel %vm72_vm0, %v3449_v5, 0.0 }
0x1b0b   :  { %3452 = vadd.xlane.f32.xlu0 %v3451_v2  ;;  %v3848_v2 = vld [vmem:[%s5031_s11 + $0x1] ss:$0 sm:$0xff] }
0x1b0f   :  { %3455 = vadd.xlane.f32.xlu0 %v3454_v12 }
0x1b94   :  { %v3453_v8 = vpop.xlane.xlu0 %3452 }
0x1b95   :  { %v3457_v13 = vmul.f32 0.03125, %v3453_v8 }
0x1b97   :  { %v3459_v14 = vadd.f32 1e-05, %v3457_v13 }
0x1b98   :  { %v3456_v15 = vpop.xlane.xlu0 %3455 }
0x1b99   :  { %4325 = vrsqrt.f32 %v3459_v14  ;;  %v3458_v17 = vmul.f32 0.03125, %v3456_v15 }
0x1b9b   :  { %v3460_v18 = vadd.f32 1e-05, %v3458_v17 }
0x1b9d   :  { %4327 = vrsqrt.f32 %v3460_v18 }
0x1ba6   :  { %v4326_v19 = vpop.eup %4325 }
0x1ba7   :  { %v3463_v20 = vmul.f32 %v4326_v19, %v3447_v61 }
0x1ba9   :  { %v3471_v22 = vmul.f32 %v3824_v16, %v3463_v20 }
0x1baa   :  { %v4328_v23 = vpop.eup %4327 }
0x1bab   :  { %v3464_v24 = vmul.f32 %v4328_v23, %v3448_v60  ;;  %v3479_v11 = vadd.f32 %v3825_v21, %v3471_v22 }
0x1bad   :  { %v3472_v25 = vmul.f32 %v3824_v16, %v3464_v24  ;;  %4212 = vmatprep.mubr.msk.f32.mxu1 %vm72_vm0, %v3479_v11 }
0x1baf   :  { %v3480_v26 = vadd.f32 %v3825_v21, %v3472_v25 }
0x1bb1   :  { %4213 = vmatmul.mubr.msk.f32.vlgmr.msra.gmra.mxu1 %vm72_vm0, %v3480_v26 }
0x1c71   :  { %v4214_v31 = vpop.f32.mrf.mxu1 }
0x1c72   :  { %v3572_v32 = vadd.f32 %v4214_v31, %v3831_v30 }
0x1c73   :  { %v3566_v33 = vpop.f32.mrf.mxu1 }
0x1c74   :  { %v3567_v34 = vadd.f32 %v3831_v30, %v3566_v33  ;;  %v3576_v36 = vmax.f32 %v3572_v32, 0.0 }
0x1c76   :  { %v3575_v35 = vmax.f32 %v3567_v34, 0.0 }
0x1c78   :  { %4231 = vmatprep.mubr.msk.f32.mxu0 %vm1761_vm5, %v3575_v35 }
0x1c79   :  { %4232 = vmatmul.mubr.msk.f32.vlgmr.msra.gmra.mxu0 %vm1761_vm5, %v3576_v36 }
0x1d39   :  { %v4233_v38 = vpop.f32.mrf.mxu0 }
0x1d3a   :  { %v3672_v39 = vadd.f32 %v4233_v38, %v3843_v37 }
0x1d3b   :  { %v3666_v40 = vpop.f32.mrf.mxu0 }
0x1d3c   :  { %v3667_v41 = vadd.f32 %v3843_v37, %v3666_v40  ;;  %v3676_v42 = vadd.f32 %v3672_v39, %v3480_v26 }
0x1d3e   :  { %v3675_v43 = vadd.f32 %v3667_v41, %v3479_v11  ;;  %v3684_v44 = vsel %vm72_vm0, %v3676_v42, 0.0 }
0x1d3f   :  { %3685 = vadd.xlane.f32.xlu0 %v3684_v44 }
0x1d40   :  { %v3681_v45 = vsel %vm72_vm0, %v3675_v43, 0.0 }
0x1d41   :  { %3682 = vadd.xlane.f32.xlu1 %v3681_v45 }
0x1dc8   :  { %v3686_v47 = vpop.xlane.xlu0 %3685 }
0x1dc9   :  { %v3688_v49 = vmul.f32 0.03125, %v3686_v47 }
0x1dca   :  { %v3683_v48 = vpop.xlane.xlu1 %3682 }
0x1dcb   :  { %v3690_v50 = vsub.f32 %v3676_v42, %v3688_v49  ;;  %v3687_v46 = vmul.f32 0.03125, %v3683_v48 }
0x1dcd   :  { %v3689_v52 = vsub.f32 %v3675_v43, %v3687_v46  ;;  %v3692_v53 = vmul.f32 %v3690_v50, %v3690_v50 }
0x1dcf   :  { %v3696_v54 = vsel %vm72_vm0, %v3692_v53, 0.0  ;;  %v3691_v51 = vmul.f32 %v3689_v52, %v3689_v52 }
0x1dd0   :  { %3697 = vadd.xlane.f32.xlu0 %v3696_v54 }
0x1dd1   :  { %v3693_v55 = vsel %vm72_vm0, %v3691_v51, 0.0 }
0x1dd2   :  { %3694 = vadd.xlane.f32.xlu1 %v3693_v55 }
0x1e59   :  { %v3698_v56 = vpop.xlane.xlu0 %3697 }
0x1e5a   :  { %v3700_v57 = vmul.f32 0.03125, %v3698_v56 }
0x1e5b   :  { %v3695_v58 = vpop.xlane.xlu1 %3694 }
0x1e5c   :  { %v3702_v59 = vadd.f32 1e-05, %v3700_v57  ;;  %v3699_v60 = vmul.f32 0.03125, %v3695_v58 }
0x1e5e   :  { %4329 = vrsqrt.f32 %v3702_v59  ;;  %v3701_v61 = vadd.f32 1e-05, %v3699_v60 }
0x1e60   :  { %4331 = vrsqrt.f32 %v3701_v61 }
0x1e6b   :  { %v4330_v5 = vpop.eup %4329 }
0x1e6c   :  { %v3706_v62 = vmul.f32 %v4330_v5, %v3690_v50 }
0x1e6d   :  { %v4332_v12 = vpop.eup %4331 }
0x1e6e   :  { %v3705_v63 = vmul.f32 %v4332_v12, %v3689_v52  ;;  %v3714_v0 = vmul.f32 %v3848_v2, %v3706_v62 }
0x1e70   :  { %v3713_v1 = vmul.f32 %v3848_v2, %v3705_v63  ;;  %v3722_v3 = vadd.f32 %v3849_v9, %v3714_v0 }
0x1e72   :  { %v3721_v4 = vadd.f32 %v3849_v9, %v3713_v1  ;;  %3724 = vst.msk [vmem:[#allocation5 + $0x8] sm:$0xff] %vm72_vm0, %v3722_v3 }
0x1e74   :  { %3723 = vst.msk [vmem:[#allocation5] sm:$0xff] %vm72_vm0, %v3721_v4 }
0x1e75   :  { %4364 = shalt.err (!%p4361_p9)
}
0x1e76   :  { %s5047_s11 = smov 128  }
0x1e77   :  { %3736 = dma.vmem_to_hbm [thread:$0]  %s3731_s26, 256, %s5033_s13, [#allocation4], %s5047_s11, %s5047_s11, %s5044_s24  }
0x1e78   :  { %4375 = dma.done.wait [#allocation4], 256  }
0x1e79   :  { %4376 = vsyncadd [#allocation4], 4294967040 }
0x1e7a   :  { %3740 = vsyncpa [#allocation3], 1 }
0x1e7b   :  { %3741 = vsyncpa [#allocation4], 1 }

</bundles_post_ra>
